<compile_context>
chip_gen: v7x
topology: tpu7x:2x2x1
jax: 0.10.0
libtpu: 0.0.40
codegen_flags: <defaults>
</compile_context>

<pallas_src>
import math
from functools import partial

import jax
import jax.numpy as jnp
from jax import lax
from jax.experimental import pallas as pl
from jax.experimental.pallas import tpu as pltpu


NEG_BIG = -1e30        # large finite negative instead of -inf (NaN-safe softmax)

# packed per-layer vector rows (shape (L, 9, C))
_LN1_W, _LN1_B, _B_Q, _B_K, _B_V, _B_O, _LN2_W, _LN2_B, _B_PROJ = range(9)


# ----------------------------- in-kernel helpers (f32) -----------------------------

def _layernorm(h, w, b, eps=1e-5):
    # matches F.layer_norm over last dim with eps=1e-5 (biased variance)
    mu = jnp.mean(h, axis=-1, keepdims=True)
    var = jnp.mean(jnp.square(h - mu), axis=-1, keepdims=True)
    return (h - mu) * lax.rsqrt(var + eps) * w + b


def _erf(x):
    # float32-accurate rational erf approximation (|err| ~ 1.2e-7)
    a = jnp.abs(x)
    t = 1.0 / (1.0 + 0.5 * a)
    tau = t * jnp.exp(
        -a * a - 1.26551223
        + t * (1.00002368
        + t * (0.37409196
        + t * (0.09678418
        + t * (-0.18628806
        + t * (0.27886807
        + t * (-1.13520398
        + t * (1.48851587
        + t * (-0.82215223
        + t * 0.17087277)))))))))
    erf_abs = 1.0 - tau
    return jnp.where(x >= 0.0, erf_abs, -erf_abs)


def _gelu_exact(x):
    # PyTorch nn.GELU() default is the exact (erf-based) GELU.
    # TODO(synk): on v5e profile the VALU Horner chain at production sizes.
    return 0.5 * x * (1.0 + _erf(x * (1.0 / math.sqrt(2.0))))


# ----------------------------- VMEM budgets from block sizes -----------------------------

def _clamp_vmem(nbytes):
    # headroom for compiler temporaries, clamped to v7x's 64 MiB physical VMEM
    return int(min(max(3 * nbytes, 32 * 1024 * 1024), 64 * 1024 * 1024))


def _layers_block_bytes(B, T, C):
    w = (3 * C * C + C * C + 4 * C * C + 4 * C * C) * 2      # bf16 per-layer weights
    vec = (9 * C + 4 * C) * 4                                # packed vectors + b_fc (f32)
    act = 2 * (B * T * C) * 4 + (B * T * C) * 2              # x in + resident out + y scratch
    return 2 * (w + vec) + act                               # double-buffered weight stream


def _lm_head_block_bytes(B, C, tile_v):
    return 2 * (tile_v * C * 2) + B * C * 4 + 2 * (B * tile_v * 4)


# ----------------------------- stacked-layer transformer kernel -----------------------------

def gpt_layers_kernel(x_ref, wqkv_ref, wo_ref, wfc_ref, wproj_ref,
                      vec_ref, bfc_ref, lnfw_ref, lnfb_ref,
                      out_ref, y_scr, *, n_head):
    B, T, C = out_ref.shape
    H = n_head
    D = C // H
    R = B * T
    scale = 1.0 / math.sqrt(D)

    # Layer 0: seed the resident output block with the embeddings; afterwards the output
    # block itself carries the residual stream across the layer grid axis.
    @pl.when(pl.program_id(0) == 0)
    def _():
        out_ref[...] = x_ref[...]

    x = out_ref[...].reshape(R, C)                 # f32 residual stream, flattened rows

    vec = vec_ref[0]                               # (9, C) packed per-layer f32 vectors

    # --- attention branch: x + attn(ln1(x)) ---
    h1 = _layernorm(x, vec[_LN1_W], vec[_LN1_B]).astype(jnp.bfloat16)

    # fused QKV projection: one lane-dense (R,C)@(C,3C) matmul
    qkv = jnp.dot(h1, wqkv_ref[0], preferred_element_type=jnp.float32)   # (R, 3C) f32
    q = (qkv[:, 0 * C:1 * C] + vec[_B_Q]).astype(jnp.bfloat16)
    k = (qkv[:, 1 * C:2 * C] + vec[_B_K]).astype(jnp.bfloat16)
    v = (qkv[:, 2 * C:3 * C] + vec[_B_V]).astype(jnp.bfloat16)

    row = lax.broadcasted_iota(jnp.int32, (T, T), 0)     # query index
    col = lax.broadcasted_iota(jnp.int32, (T, T), 1)     # key index
    causal = (col <= row)[None, :, :]                    # (1, T, T)

    # Per-head scores / softmax / context, batched over B with 3-D einsums.  Each head's
    # intermediates die at the scratch store, so vreg live ranges stay bounded; head
    # outputs land in their concat slots so the output projection is a single matmul.
    for hd in range(H):
        off = hd * D
        qh = q[:, off:off + D].reshape(B, T, D)
        kh = k[:, off:off + D].reshape(B, T, D)
        vh = v[:, off:off + D].reshape(B, T, D)

        s = jnp.einsum('bqd,bkd->bqk', qh, kh,
                       preferred_element_type=jnp.float32) * scale
        s = jnp.where(causal, s, NEG_BIG)
        m = jnp.max(s, axis=-1, keepdims=True)           # softmax in f32 (exact)
        e = jnp.exp(s - m)
        p = e / jnp.sum(e, axis=-1, keepdims=True)

        yh = jnp.einsum('bqk,bkd->bqd', p.astype(jnp.bfloat16), vh,
                        preferred_element_type=jnp.float32)
        y_scr[:, off:off + D] = yh.reshape(R, D).astype(jnp.bfloat16)

    # single full-width output projection on the concatenated head outputs
    attn = jnp.dot(y_scr[...], wo_ref[0], preferred_element_type=jnp.float32) + vec[_B_O]
    x = x + attn

    # --- MLP branch: x + mlp(ln2(x)) ---
    h2 = _layernorm(x, vec[_LN2_W], vec[_LN2_B]).astype(jnp.bfloat16)
    f = jnp.dot(h2, wfc_ref[0], preferred_element_type=jnp.float32) + bfc_ref[0, 0]
    f = _gelu_exact(f)                                   # f32 elementwise
    o = jnp.dot(f.astype(jnp.bfloat16), wproj_ref[0],
                preferred_element_type=jnp.float32) + vec[_B_PROJ]
    x_new = x + o

    out_ref[...] = x_new.reshape(B, T, C)

    # fuse ln_f into the last layer step so the lm_head is a pure matmul per vocab tile
    @pl.when(pl.program_id(0) == pl.num_programs(0) - 1)
    def _():
        out_ref[...] = _layernorm(x_new, lnfw_ref[0], lnfb_ref[0]).reshape(B, T, C)


def run_layers(x, params, n_head):
    B, T, C = x.shape
    L = params["w_qkv"].shape[0]

    in_specs = [
        pl.BlockSpec((B, T, C), lambda l: (0, 0, 0)),          # embeddings (fetched once)
        pl.BlockSpec((1, C, 3 * C), lambda l: (l, 0, 0)),      # w_qkv
        pl.BlockSpec((1, C, C), lambda l: (l, 0, 0)),          # w_o
        pl.BlockSpec((1, C, 4 * C), lambda l: (l, 0, 0)),      # w_fc
        pl.BlockSpec((1, 4 * C, C), lambda l: (l, 0, 0)),      # w_proj
        pl.BlockSpec((1, 9, C), lambda l: (l, 0, 0)),          # packed per-layer vectors
        pl.BlockSpec((1, 1, 4 * C), lambda l: (l, 0, 0)),      # b_fc
        pl.BlockSpec((1, C), lambda l: (0, 0)),                # ln_f weight (fetched once)
        pl.BlockSpec((1, C), lambda l: (0, 0)),                # ln_f bias   (fetched once)
    ]

    kern = partial(gpt_layers_kernel, n_head=n_head)
    return pl.pallas_call(
        kern,
        out_shape=jax.ShapeDtypeStruct((B, T, C), jnp.float32),
        grid=(L,),
        in_specs=in_specs,
        out_specs=pl.BlockSpec((B, T, C), lambda l: (0, 0, 0)),
        scratch_shapes=[pltpu.VMEM((B * T, C), jnp.bfloat16)],  # concat'd head outputs
        compiler_params=pltpu.CompilerParams(
            dimension_semantics=("arbitrary",),                 # sequential layer dependence
            vmem_limit_bytes=_clamp_vmem(_layers_block_bytes(B, T, C))),
    )(x, params["w_qkv"], params["w_o"], params["w_fc"], params["w_proj"],
      params["vecs"], params["b_fc"], params["ln_f_w"], params["ln_f_b"])


# ----------------------------- tied lm_head (vocab-tiled, pure matmul) -----------------------------

def lm_head_kernel(x_ref, wte_ref, out_ref):
    # x is already ln_f-normalized (fused into the last layer step).
    # contract on wte's C axis directly (no transposed weight copy anywhere)
    out_ref[...] = lax.dot_general(
        x_ref[...].astype(jnp.bfloat16), wte_ref[...],
        dimension_numbers=(((1,), (1,)), ((), ())),
        preferred_element_type=jnp.float32)                     # (B, TILE_V)


def run_lm_head(x_last, wte, *, max_tile_v=2048):
    B, C = x_last.shape
    V = wte.shape[0]
    # pick a lane-dense vocab tile (multiple of 128) that divides V
    tile_v = min(max_tile_v, V)
    tile_v = max(128, (tile_v // 128) * 128)
    while tile_v > 128 and V % tile_v != 0:
        tile_v -= 128
    if V % tile_v != 0:
        tile_v = V

    return pl.pallas_call(
        lm_head_kernel,
        out_shape=jax.ShapeDtypeStruct((B, V), jnp.float32),
        grid=(V // tile_v,),
        in_specs=[pl.BlockSpec((B, C), lambda v: (0, 0)),
                  pl.BlockSpec((tile_v, C), lambda v: (v, 0))],
        out_specs=pl.BlockSpec((B, tile_v), lambda v: (0, v)),
        compiler_params=pltpu.CompilerParams(
            dimension_semantics=("parallel",),
            vmem_limit_bytes=_clamp_vmem(_lm_head_block_bytes(B, C, tile_v))),
    )(x_last, wte)


# ----------------------------- parameters & forward -----------------------------

def init_params(key, cfg):
    V, BS, L, C = cfg["vocab_size"], cfg["block_size"], cfg["n_layer"], cfg["n_embd"]
    std = 0.02
    proj_std = 0.02 / math.sqrt(2 * L)                   # c_proj.weight special init

    keys = jax.random.split(key, 6)

    def nrm(kk, shape, s, dtype=jnp.bfloat16):
        return (jax.random.normal(kk, shape, dtype=jnp.float32) * s).astype(dtype)

    vecs = jnp.zeros((L, 9, C), jnp.float32)             # biases zero
    vecs = vecs.at[:, _LN1_W].set(1.0)                   # ln1 weight
    vecs = vecs.at[:, _LN2_W].set(1.0)                   # ln2 weight

    params = {
        "wte": nrm(keys[0], (V, C), std),                # bf16, tied with lm_head
        "wpe": nrm(keys[1], (BS, C), std, jnp.float32),
        "ln_f_w": jnp.ones((1, C), jnp.float32),
        "ln_f_b": jnp.zeros((1, C), jnp.float32),
        # full-width, lane-dense weight layouts (bf16)
        "w_qkv": nrm(keys[2], (L, C, 3 * C), std),
        "w_o": nrm(keys[3], (L, C, C), proj_std),
        "w_fc": nrm(keys[4], (L, C, 4 * C), std),
        "w_proj": nrm(keys[5], (L, 4 * C, C), proj_std),
        # packed small per-layer f32 vectors + lane-dense MLP bias
        "vecs": vecs,
        "b_fc": jnp.zeros((L, 1, 4 * C), jnp.float32),
    }
    return params


def gpt_forward(idx, params, cfg, lm_head_tile_v=2048):
    """targets=None path of GPT.forward: returns (logits (B,1,V), None, None)."""
    B, T = idx.shape
    assert T <= cfg["block_size"]
    tok_emb = params["wte"][idx].astype(jnp.float32)     # (B, T, C) gather - plain JAX glue
    pos_emb = params["wpe"][:T]                          # (T, C)
    x = tok_emb + pos_emb                                # dropout p=0.0 -> identity

    x = run_layers(x, params, cfg["n_head"])             # all layers (+ fused ln_f) in one call

    x_last = x[:, -1, :]                                 # (B, C)  -- mirrors x[:, [-1], :]
    logits = run_lm_head(x_last, params["wte"], max_tile_v=lm_head_tile_v)
    logits = logits[:, None, :]                          # (B, 1, V)
    return logits, None, None


# ----------------------------- main -----------------------------

if __name__ == "__main__":
    cfg = dict(block_size=64, vocab_size=512, n_layer=2, n_head=4,
               n_embd=128, dropout=0.0, bias=True)

    key = jax.random.PRNGKey(0)
    pkey, ikey = jax.random.split(key)
    params = init_params(pkey, cfg)

    B, T = 2, 8
    idx = jax.random.randint(ikey, (B, T), 0, cfg["vocab_size"], dtype=jnp.int32)

    # small vocab tile so the demo exercises the tiled lm_head grid (512 / 256 = 2 tiles)
    logits, loss, acc = gpt_forward(idx, params, cfg, lm_head_tile_v=256)
    logits = jax.block_until_ready(logits)

    assert logits.shape == (B, 1, cfg["vocab_size"]), logits.shape
    assert bool(jnp.all(jnp.isfinite(logits)))
    print("KERNEL_OK")
</pallas_src>

<mosaic_0001>
module attributes {stable_mosaic.version = 11 : i64} {
  func.func @gpt_layers_kernel(%arg0: i32, %arg1: memref<2x8x128xf32, #tpu.memory_space<vmem>>, %arg2: memref<1x128x384xbf16, #tpu.memory_space<vmem>>, %arg3: memref<1x128x128xbf16, #tpu.memory_space<vmem>>, %arg4: memref<1x128x512xbf16, #tpu.memory_space<vmem>>, %arg5: memref<1x512x128xbf16, #tpu.memory_space<vmem>>, %arg6: memref<1x9x128xf32, #tpu.memory_space<vmem>>, %arg7: memref<1x1x512xf32, #tpu.memory_space<vmem>>, %arg8: memref<1x128xf32, #tpu.memory_space<vmem>>, %arg9: memref<1x128xf32, #tpu.memory_space<vmem>>, %arg10: memref<2x8x128xf32, #tpu.memory_space<vmem>>, %arg11: memref<16x128xbf16, #tpu.memory_space<vmem>>) attributes {dimension_semantics = [#tpu.dimension_semantics<arbitrary>], iteration_bounds = array<i64: 2>, scalar_prefetch = 0 : i64, scratch_operands = 1 : i64, tpu.core_type = #tpu.core_type<tc>, window_params = [{pipeline_mode = #tpu.pipeline_mode<synchronous>, transform_indices = @transform_0, window_bounds = array<i64: 2, 8, 128>}, {transform_indices = @transform_1, window_bounds = array<i64: 1, 128, 384>}, {transform_indices = @transform_2, window_bounds = array<i64: 1, 128, 128>}, {transform_indices = @transform_3, window_bounds = array<i64: 1, 128, 512>}, {transform_indices = @transform_4, window_bounds = array<i64: 1, 512, 128>}, {transform_indices = @transform_5, window_bounds = array<i64: 1, 9, 128>}, {transform_indices = @transform_6, window_bounds = array<i64: 1, 1, 512>}, {pipeline_mode = #tpu.pipeline_mode<synchronous>, transform_indices = @transform_7, window_bounds = array<i64: 1, 128>}, {pipeline_mode = #tpu.pipeline_mode<synchronous>, transform_indices = @transform_8, window_bounds = array<i64: 1, 128>}, {pipeline_mode = #tpu.pipeline_mode<synchronous>, transform_indices = @transform_9, window_bounds = array<i64: 2, 8, 128>}]} {
    %c0_i32 = arith.constant 0 : i32
    %0 = arith.cmpi eq, %arg0, %c0_i32 : i32
    %1 = arith.extui %0 : i1 to i32
    %c0_i32_0 = arith.constant 0 : i32
    %2 = arith.cmpi ne, %1, %c0_i32_0 : i32
    scf.if %2 {
      %c0_89 = arith.constant 0 : index
      %c0_90 = arith.constant 0 : index
      %c0_91 = arith.constant 0 : index
      %289 = vector.load %arg1[%c0_89, %c0_90, %c0_91] : memref<2x8x128xf32, #tpu.memory_space<vmem>>, vector<2x8x128xf32>
      %c0_92 = arith.constant 0 : index
      %c0_93 = arith.constant 0 : index
      %c0_94 = arith.constant 0 : index
      %290 = vector.load %arg10[%c0_92, %c0_93, %c0_94] : memref<2x8x128xf32, #tpu.memory_space<vmem>>, vector<2x8x128xf32>
      tpu.vector_store %arg10[%c0_92, %c0_93, %c0_94], %289 {strides = array<i32>} : memref<2x8x128xf32, #tpu.memory_space<vmem>>, vector<2x8x128xf32>,
    } else {
    }
    %c0 = arith.constant 0 : index
    %c0_1 = arith.constant 0 : index
    %c0_2 = arith.constant 0 : index
    %3 = vector.load %arg10[%c0, %c0_1, %c0_2] : memref<2x8x128xf32, #tpu.memory_space<vmem>>, vector<2x8x128xf32>
    %4 = vector.shape_cast %3 : vector<2x8x128xf32> to vector<16x128xf32>
    %c0_3 = arith.constant 0 : index
    %c0_4 = arith.constant 0 : index
    %c0_5 = arith.constant 0 : index
    %5 = vector.load %arg6[%c0_3, %c0_4, %c0_5] : memref<1x9x128xf32, #tpu.memory_space<vmem>>, vector<1x9x128xf32>
    %6 = vector.shape_cast %5 : vector<1x9x128xf32> to vector<9x128xf32>
    %7 = vector.extract_strided_slice %6 {offsets = [0, 0], sizes = [1, 128], strides = [1, 1]} : vector<9x128xf32> to vector<1x128xf32>
    %8 = vector.shape_cast %7 : vector<1x128xf32> to vector<128xf32>
    %9 = vector.extract_strided_slice %6 {offsets = [1, 0], sizes = [1, 128], strides = [1, 1]} : vector<9x128xf32> to vector<1x128xf32>
    %10 = vector.shape_cast %9 : vector<1x128xf32> to vector<128xf32>
    %cst = arith.constant dense<0.000000e+00> : vector<16xf32>
    %11 = vector.multi_reduction <add>, %4, %cst [1] : vector<16x128xf32> to vector<16xf32>
    %12 = vector.shape_cast %11 : vector<16xf32> to vector<16x1xf32>
    %cst_6 = arith.constant 1.280000e+02 : f32
    %13 = vector.broadcast %cst_6 : f32 to vector<16x1xf32>
    %14 = arith.divf %12, %13 : vector<16x1xf32>
    %15 = vector.broadcast %14 : vector<16x1xf32> to vector<16x128xf32>
    %16 = arith.subf %4, %15 : vector<16x128xf32>
    %17 = arith.mulf %16, %16 : vector<16x128xf32>
    %cst_7 = arith.constant dense<0.000000e+00> : vector<16xf32>
    %18 = vector.multi_reduction <add>, %17, %cst_7 [1] : vector<16x128xf32> to vector<16xf32>
    %19 = vector.shape_cast %18 : vector<16xf32> to vector<16x1xf32>
    %cst_8 = arith.constant 1.280000e+02 : f32
    %20 = vector.broadcast %cst_8 : f32 to vector<16x1xf32>
    %21 = arith.divf %19, %20 : vector<16x1xf32>
    %22 = vector.broadcast %14 : vector<16x1xf32> to vector<16x128xf32>
    %23 = arith.subf %4, %22 : vector<16x128xf32>
    %cst_9 = arith.constant 9.99999974E-6 : f32
    %24 = vector.broadcast %cst_9 : f32 to vector<16x1xf32>
    %25 = arith.addf %21, %24 : vector<16x1xf32>
    %26 = math.rsqrt %25 : vector<16x1xf32>
    %27 = vector.broadcast %26 : vector<16x1xf32> to vector<16x128xf32>
    %28 = arith.mulf %23, %27 : vector<16x128xf32>
    %29 = vector.shape_cast %8 : vector<128xf32> to vector<1x128xf32>
    %30 = vector.broadcast %29 : vector<1x128xf32> to vector<16x128xf32>
    %31 = arith.mulf %28, %30 : vector<16x128xf32>
    %32 = vector.shape_cast %10 : vector<128xf32> to vector<1x128xf32>
    %33 = vector.broadcast %32 : vector<1x128xf32> to vector<16x128xf32>
    %34 = arith.addf %31, %33 : vector<16x128xf32>
    %35 = arith.truncf %34 : vector<16x128xf32> to vector<16x128xbf16>
    %c0_10 = arith.constant 0 : index
    %c0_11 = arith.constant 0 : index
    %c0_12 = arith.constant 0 : index
    %36 = vector.load %arg2[%c0_10, %c0_11, %c0_12] : memref<1x128x384xbf16, #tpu.memory_space<vmem>>, vector<1x128x384xbf16>
    %37 = vector.shape_cast %36 : vector<1x128x384xbf16> to vector<128x384xbf16>
    %cst_13 = arith.constant dense<0.000000e+00> : vector<16x384xf32>
    %38 = tpu.matmul %35, %37, %cst_13 {dimension_numbers = #tpu.dot_dimension_numbers<[1], [0], [0], [1], [0, 0, 1, 1], [], []>} : vector<16x128xbf16>, vector<128x384xbf16>, vector<16x384xf32> -> vector<16x384xf32>
    %39 = vector.extract_strided_slice %38 {offsets = [0, 0], sizes = [16, 128], strides = [1, 1]} : vector<16x384xf32> to vector<16x128xf32>
    %40 = vector.extract_strided_slice %6 {offsets = [2, 0], sizes = [1, 128], strides = [1, 1]} : vector<9x128xf32> to vector<1x128xf32>
    %41 = vector.shape_cast %40 : vector<1x128xf32> to vector<128xf32>
    %42 = vector.shape_cast %41 : vector<128xf32> to vector<1x128xf32>
    %43 = vector.broadcast %42 : vector<1x128xf32> to vector<16x128xf32>
    %44 = arith.addf %39, %43 : vector<16x128xf32>
    %45 = arith.truncf %44 : vector<16x128xf32> to vector<16x128xbf16>
    %46 = vector.extract_strided_slice %38 {offsets = [0, 128], sizes = [16, 128], strides = [1, 1]} : vector<16x384xf32> to vector<16x128xf32>
    %47 = vector.extract_strided_slice %6 {offsets = [3, 0], sizes = [1, 128], strides = [1, 1]} : vector<9x128xf32> to vector<1x128xf32>
    %48 = vector.shape_cast %47 : vector<1x128xf32> to vector<128xf32>
    %49 = vector.shape_cast %48 : vector<128xf32> to vector<1x128xf32>
    %50 = vector.broadcast %49 : vector<1x128xf32> to vector<16x128xf32>
    %51 = arith.addf %46, %50 : vector<16x128xf32>
    %52 = arith.truncf %51 : vector<16x128xf32> to vector<16x128xbf16>
    %53 = vector.extract_strided_slice %38 {offsets = [0, 256], sizes = [16, 128], strides = [1, 1]} : vector<16x384xf32> to vector<16x128xf32>
    %54 = vector.extract_strided_slice %6 {offsets = [4, 0], sizes = [1, 128], strides = [1, 1]} : vector<9x128xf32> to vector<1x128xf32>
    %55 = vector.shape_cast %54 : vector<1x128xf32> to vector<128xf32>
    %56 = vector.shape_cast %55 : vector<128xf32> to vector<1x128xf32>
    %57 = vector.broadcast %56 : vector<1x128xf32> to vector<16x128xf32>
    %58 = arith.addf %53, %57 : vector<16x128xf32>
    %59 = arith.truncf %58 : vector<16x128xf32> to vector<16x128xbf16>
    %60 = tpu.iota {dimensions = array<i32: 0>} : vector<8x8xi32>
    %61 = tpu.iota {dimensions = array<i32: 1>} : vector<8x8xi32>
    %62 = arith.cmpi sle, %61, %60 : vector<8x8xi32>
    %63 = vector.shape_cast %62 : vector<8x8xi1> to vector<1x8x8xi1>
    %64 = vector.extract_strided_slice %45 {offsets = [0, 0], sizes = [16, 32], strides = [1, 1]} : vector<16x128xbf16> to vector<16x32xbf16>
    %65 = vector.shape_cast %64 : vector<16x32xbf16> to vector<2x8x32xbf16>
    %66 = vector.extract_strided_slice %52 {offsets = [0, 0], sizes = [16, 32], strides = [1, 1]} : vector<16x128xbf16> to vector<16x32xbf16>
    %67 = vector.shape_cast %66 : vector<16x32xbf16> to vector<2x8x32xbf16>
    %68 = vector.extract_strided_slice %59 {offsets = [0, 0], sizes = [16, 32], strides = [1, 1]} : vector<16x128xbf16> to vector<16x32xbf16>
    %69 = vector.shape_cast %68 : vector<16x32xbf16> to vector<2x8x32xbf16>
    "tpu.trace_start"() <{level = 10 : i32, message = "bqd,bkd->bqk"}> : () -> ()
    %cst_14 = arith.constant dense<0.000000e+00> : vector<2x8x8xf32>
    %70 = tpu.matmul %65, %67, %cst_14 {dimension_numbers = #tpu.dot_dimension_numbers<[2], [2], [1], [1], [0, 0, 0, 1, 1, 1], [0], [0]>} : vector<2x8x32xbf16>, vector<2x8x32xbf16>, vector<2x8x8xf32> -> vector<2x8x8xf32>
    "tpu.trace_stop"() : () -> ()
    %cst_15 = arith.constant 0.176776692 : f32
    %71 = vector.broadcast %cst_15 : f32 to vector<2x8x8xf32>
    %72 = arith.mulf %70, %71 : vector<2x8x8xf32>
    %cst_16 = arith.constant -1.000000e+30 : f32
    %73 = vector.shape_cast %63 : vector<1x8x8xi1> to vector<1x8x8xi1>
    %74 = vector.broadcast %73 : vector<1x8x8xi1> to vector<2x8x8xi1>
    %75 = vector.broadcast %cst_16 : f32 to vector<2x8x8xf32>
    %76 = arith.select %74, %72, %75 : vector<2x8x8xi1>, vector<2x8x8xf32>
    %cst_17 = arith.constant dense<0xFF800000> : vector<2x8xf32>
    %77 = vector.multi_reduction <maximumf>, %76, %cst_17 [2] : vector<2x8x8xf32> to vector<2x8xf32>
    %78 = vector.shape_cast %77 : vector<2x8xf32> to vector<2x8x1xf32>
    %79 = vector.broadcast %78 : vector<2x8x1xf32> to vector<2x8x8xf32>
    %80 = arith.subf %76, %79 : vector<2x8x8xf32>
    %81 = math.exp %80 : vector<2x8x8xf32>
    %cst_18 = arith.constant dense<0.000000e+00> : vector<2x8xf32>
    %82 = vector.multi_reduction <add>, %81, %cst_18 [2] : vector<2x8x8xf32> to vector<2x8xf32>
    %83 = vector.shape_cast %82 : vector<2x8xf32> to vector<2x8x1xf32>
    %84 = vector.broadcast %83 : vector<2x8x1xf32> to vector<2x8x8xf32>
    %85 = arith.divf %81, %84 : vector<2x8x8xf32>
    %86 = arith.truncf %85 : vector<2x8x8xf32> to vector<2x8x8xbf16>
    "tpu.trace_start"() <{level = 10 : i32, message = "bqk,bkd->bqd"}> : () -> ()
    %cst_19 = arith.constant dense<0.000000e+00> : vector<2x8x32xf32>
    %87 = tpu.matmul %86, %69, %cst_19 {dimension_numbers = #tpu.dot_dimension_numbers<[2], [1], [1], [2], [0, 0, 0, 1, 1, 2], [0], [0]>} : vector<2x8x8xbf16>, vector<2x8x32xbf16>, vector<2x8x32xf32> -> vector<2x8x32xf32>
    "tpu.trace_stop"() : () -> ()
    %88 = vector.shape_cast %87 : vector<2x8x32xf32> to vector<16x32xf32>
    %89 = arith.truncf %88 : vector<16x32xf32> to vector<16x32xbf16>
    %c0_20 = arith.constant 0 : index
    %c0_21 = arith.constant 0 : index
    %90 = vector.load %arg11[%c0_20, %c0_21] : memref<16x128xbf16, #tpu.memory_space<vmem>>, vector<16x32xbf16>
    tpu.vector_store %arg11[%c0_20, %c0_21], %89 {strides = array<i32>} : memref<16x128xbf16, #tpu.memory_space<vmem>>, vector<16x32xbf16>,
    %91 = vector.extract_strided_slice %45 {offsets = [0, 32], sizes = [16, 32], strides = [1, 1]} : vector<16x128xbf16> to vector<16x32xbf16>
    %92 = vector.shape_cast %91 : vector<16x32xbf16> to vector<2x8x32xbf16>
    %93 = vector.extract_strided_slice %52 {offsets = [0, 32], sizes = [16, 32], strides = [1, 1]} : vector<16x128xbf16> to vector<16x32xbf16>
    %94 = vector.shape_cast %93 : vector<16x32xbf16> to vector<2x8x32xbf16>
    %95 = vector.extract_strided_slice %59 {offsets = [0, 32], sizes = [16, 32], strides = [1, 1]} : vector<16x128xbf16> to vector<16x32xbf16>
    %96 = vector.shape_cast %95 : vector<16x32xbf16> to vector<2x8x32xbf16>
    "tpu.trace_start"() <{level = 10 : i32, message = "bqd,bkd->bqk"}> : () -> ()
    %cst_22 = arith.constant dense<0.000000e+00> : vector<2x8x8xf32>
    %97 = tpu.matmul %92, %94, %cst_22 {dimension_numbers = #tpu.dot_dimension_numbers<[2], [2], [1], [1], [0, 0, 0, 1, 1, 1], [0], [0]>} : vector<2x8x32xbf16>, vector<2x8x32xbf16>, vector<2x8x8xf32> -> vector<2x8x8xf32>
    "tpu.trace_stop"() : () -> ()
    %cst_23 = arith.constant 0.176776692 : f32
    %98 = vector.broadcast %cst_23 : f32 to vector<2x8x8xf32>
    %99 = arith.mulf %97, %98 : vector<2x8x8xf32>
    %cst_24 = arith.constant -1.000000e+30 : f32
    %100 = vector.shape_cast %63 : vector<1x8x8xi1> to vector<1x8x8xi1>
    %101 = vector.broadcast %100 : vector<1x8x8xi1> to vector<2x8x8xi1>
    %102 = vector.broadcast %cst_24 : f32 to vector<2x8x8xf32>
    %103 = arith.select %101, %99, %102 : vector<2x8x8xi1>, vector<2x8x8xf32>
    %cst_25 = arith.constant dense<0xFF800000> : vector<2x8xf32>
    %104 = vector.multi_reduction <maximumf>, %103, %cst_25 [2] : vector<2x8x8xf32> to vector<2x8xf32>
    %105 = vector.shape_cast %104 : vector<2x8xf32> to vector<2x8x1xf32>
    %106 = vector.broadcast %105 : vector<2x8x1xf32> to vector<2x8x8xf32>
    %107 = arith.subf %103, %106 : vector<2x8x8xf32>
    %108 = math.exp %107 : vector<2x8x8xf32>
    %cst_26 = arith.constant dense<0.000000e+00> : vector<2x8xf32>
    %109 = vector.multi_reduction <add>, %108, %cst_26 [2] : vector<2x8x8xf32> to vector<2x8xf32>
    %110 = vector.shape_cast %109 : vector<2x8xf32> to vector<2x8x1xf32>
    %111 = vector.broadcast %110 : vector<2x8x1xf32> to vector<2x8x8xf32>
    %112 = arith.divf %108, %111 : vector<2x8x8xf32>
    %113 = arith.truncf %112 : vector<2x8x8xf32> to vector<2x8x8xbf16>
    "tpu.trace_start"() <{level = 10 : i32, message = "bqk,bkd->bqd"}> : () -> ()
    %cst_27 = arith.constant dense<0.000000e+00> : vector<2x8x32xf32>
    %114 = tpu.matmul %113, %96, %cst_27 {dimension_numbers = #tpu.dot_dimension_numbers<[2], [1], [1], [2], [0, 0, 0, 1, 1, 2], [0], [0]>} : vector<2x8x8xbf16>, vector<2x8x32xbf16>, vector<2x8x32xf32> -> vector<2x8x32xf32>
    "tpu.trace_stop"() : () -> ()
    %115 = vector.shape_cast %114 : vector<2x8x32xf32> to vector<16x32xf32>
    %116 = arith.truncf %115 : vector<16x32xf32> to vector<16x32xbf16>
    %c0_28 = arith.constant 0 : index
    %c32 = arith.constant 32 : index
    %117 = vector.load %arg11[%c0_28, %c32] : memref<16x128xbf16, #tpu.memory_space<vmem>>, vector<16x32xbf16>
    tpu.vector_store %arg11[%c0_28, %c32], %116 {strides = array<i32>} : memref<16x128xbf16, #tpu.memory_space<vmem>>, vector<16x32xbf16>,
    %118 = vector.extract_strided_slice %45 {offsets = [0, 64], sizes = [16, 32], strides = [1, 1]} : vector<16x128xbf16> to vector<16x32xbf16>
    %119 = vector.shape_cast %118 : vector<16x32xbf16> to vector<2x8x32xbf16>
    %120 = vector.extract_strided_slice %52 {offsets = [0, 64], sizes = [16, 32], strides = [1, 1]} : vector<16x128xbf16> to vector<16x32xbf16>
    %121 = vector.shape_cast %120 : vector<16x32xbf16> to vector<2x8x32xbf16>
    %122 = vector.extract_strided_slice %59 {offsets = [0, 64], sizes = [16, 32], strides = [1, 1]} : vector<16x128xbf16> to vector<16x32xbf16>
    %123 = vector.shape_cast %122 : vector<16x32xbf16> to vector<2x8x32xbf16>
    "tpu.trace_start"() <{level = 10 : i32, message = "bqd,bkd->bqk"}> : () -> ()
    %cst_29 = arith.constant dense<0.000000e+00> : vector<2x8x8xf32>
    %124 = tpu.matmul %119, %121, %cst_29 {dimension_numbers = #tpu.dot_dimension_numbers<[2], [2], [1], [1], [0, 0, 0, 1, 1, 1], [0], [0]>} : vector<2x8x32xbf16>, vector<2x8x32xbf16>, vector<2x8x8xf32> -> vector<2x8x8xf32>
    "tpu.trace_stop"() : () -> ()
    %cst_30 = arith.constant 0.176776692 : f32
    %125 = vector.broadcast %cst_30 : f32 to vector<2x8x8xf32>
    %126 = arith.mulf %124, %125 : vector<2x8x8xf32>
    %cst_31 = arith.constant -1.000000e+30 : f32
    %127 = vector.shape_cast %63 : vector<1x8x8xi1> to vector<1x8x8xi1>
    %128 = vector.broadcast %127 : vector<1x8x8xi1> to vector<2x8x8xi1>
    %129 = vector.broadcast %cst_31 : f32 to vector<2x8x8xf32>
    %130 = arith.select %128, %126, %129 : vector<2x8x8xi1>, vector<2x8x8xf32>
    %cst_32 = arith.constant dense<0xFF800000> : vector<2x8xf32>
    %131 = vector.multi_reduction <maximumf>, %130, %cst_32 [2] : vector<2x8x8xf32> to vector<2x8xf32>
    %132 = vector.shape_cast %131 : vector<2x8xf32> to vector<2x8x1xf32>
    %133 = vector.broadcast %132 : vector<2x8x1xf32> to vector<2x8x8xf32>
    %134 = arith.subf %130, %133 : vector<2x8x8xf32>
    %135 = math.exp %134 : vector<2x8x8xf32>
    %cst_33 = arith.constant dense<0.000000e+00> : vector<2x8xf32>
    %136 = vector.multi_reduction <add>, %135, %cst_33 [2] : vector<2x8x8xf32> to vector<2x8xf32>
    %137 = vector.shape_cast %136 : vector<2x8xf32> to vector<2x8x1xf32>
    %138 = vector.broadcast %137 : vector<2x8x1xf32> to vector<2x8x8xf32>
    %139 = arith.divf %135, %138 : vector<2x8x8xf32>
    %140 = arith.truncf %139 : vector<2x8x8xf32> to vector<2x8x8xbf16>
    "tpu.trace_start"() <{level = 10 : i32, message = "bqk,bkd->bqd"}> : () -> ()
    %cst_34 = arith.constant dense<0.000000e+00> : vector<2x8x32xf32>
    %141 = tpu.matmul %140, %123, %cst_34 {dimension_numbers = #tpu.dot_dimension_numbers<[2], [1], [1], [2], [0, 0, 0, 1, 1, 2], [0], [0]>} : vector<2x8x8xbf16>, vector<2x8x32xbf16>, vector<2x8x32xf32> -> vector<2x8x32xf32>
    "tpu.trace_stop"() : () -> ()
    %142 = vector.shape_cast %141 : vector<2x8x32xf32> to vector<16x32xf32>
    %143 = arith.truncf %142 : vector<16x32xf32> to vector<16x32xbf16>
    %c0_35 = arith.constant 0 : index
    %c64 = arith.constant 64 : index
    %144 = vector.load %arg11[%c0_35, %c64] : memref<16x128xbf16, #tpu.memory_space<vmem>>, vector<16x32xbf16>
    tpu.vector_store %arg11[%c0_35, %c64], %143 {strides = array<i32>} : memref<16x128xbf16, #tpu.memory_space<vmem>>, vector<16x32xbf16>,
    %145 = vector.extract_strided_slice %45 {offsets = [0, 96], sizes = [16, 32], strides = [1, 1]} : vector<16x128xbf16> to vector<16x32xbf16>
    %146 = vector.shape_cast %145 : vector<16x32xbf16> to vector<2x8x32xbf16>
    %147 = vector.extract_strided_slice %52 {offsets = [0, 96], sizes = [16, 32], strides = [1, 1]} : vector<16x128xbf16> to vector<16x32xbf16>
    %148 = vector.shape_cast %147 : vector<16x32xbf16> to vector<2x8x32xbf16>
    %149 = vector.extract_strided_slice %59 {offsets = [0, 96], sizes = [16, 32], strides = [1, 1]} : vector<16x128xbf16> to vector<16x32xbf16>
    %150 = vector.shape_cast %149 : vector<16x32xbf16> to vector<2x8x32xbf16>
    "tpu.trace_start"() <{level = 10 : i32, message = "bqd,bkd->bqk"}> : () -> ()
    %cst_36 = arith.constant dense<0.000000e+00> : vector<2x8x8xf32>
    %151 = tpu.matmul %146, %148, %cst_36 {dimension_numbers = #tpu.dot_dimension_numbers<[2], [2], [1], [1], [0, 0, 0, 1, 1, 1], [0], [0]>} : vector<2x8x32xbf16>, vector<2x8x32xbf16>, vector<2x8x8xf32> -> vector<2x8x8xf32>
    "tpu.trace_stop"() : () -> ()
    %cst_37 = arith.constant 0.176776692 : f32
    %152 = vector.broadcast %cst_37 : f32 to vector<2x8x8xf32>
    %153 = arith.mulf %151, %152 : vector<2x8x8xf32>
    %cst_38 = arith.constant -1.000000e+30 : f32
    %154 = vector.shape_cast %63 : vector<1x8x8xi1> to vector<1x8x8xi1>
    %155 = vector.broadcast %154 : vector<1x8x8xi1> to vector<2x8x8xi1>
    %156 = vector.broadcast %cst_38 : f32 to vector<2x8x8xf32>
    %157 = arith.select %155, %153, %156 : vector<2x8x8xi1>, vector<2x8x8xf32>
    %cst_39 = arith.constant dense<0xFF800000> : vector<2x8xf32>
    %158 = vector.multi_reduction <maximumf>, %157, %cst_39 [2] : vector<2x8x8xf32> to vector<2x8xf32>
    %159 = vector.shape_cast %158 : vector<2x8xf32> to vector<2x8x1xf32>
    %160 = vector.broadcast %159 : vector<2x8x1xf32> to vector<2x8x8xf32>
    %161 = arith.subf %157, %160 : vector<2x8x8xf32>
    %162 = math.exp %161 : vector<2x8x8xf32>
    %cst_40 = arith.constant dense<0.000000e+00> : vector<2x8xf32>
    %163 = vector.multi_reduction <add>, %162, %cst_40 [2] : vector<2x8x8xf32> to vector<2x8xf32>
    %164 = vector.shape_cast %163 : vector<2x8xf32> to vector<2x8x1xf32>
    %165 = vector.broadcast %164 : vector<2x8x1xf32> to vector<2x8x8xf32>
    %166 = arith.divf %162, %165 : vector<2x8x8xf32>
    %167 = arith.truncf %166 : vector<2x8x8xf32> to vector<2x8x8xbf16>
    "tpu.trace_start"() <{level = 10 : i32, message = "bqk,bkd->bqd"}> : () -> ()
    %cst_41 = arith.constant dense<0.000000e+00> : vector<2x8x32xf32>
    %168 = tpu.matmul %167, %150, %cst_41 {dimension_numbers = #tpu.dot_dimension_numbers<[2], [1], [1], [2], [0, 0, 0, 1, 1, 2], [0], [0]>} : vector<2x8x8xbf16>, vector<2x8x32xbf16>, vector<2x8x32xf32> -> vector<2x8x32xf32>
    "tpu.trace_stop"() : () -> ()
    %169 = vector.shape_cast %168 : vector<2x8x32xf32> to vector<16x32xf32>
    %170 = arith.truncf %169 : vector<16x32xf32> to vector<16x32xbf16>
    %c0_42 = arith.constant 0 : index
    %c96 = arith.constant 96 : index
    %171 = vector.load %arg11[%c0_42, %c96] : memref<16x128xbf16, #tpu.memory_space<vmem>>, vector<16x32xbf16>
    tpu.vector_store %arg11[%c0_42, %c96], %170 {strides = array<i32>} : memref<16x128xbf16, #tpu.memory_space<vmem>>, vector<16x32xbf16>,
    %c0_43 = arith.constant 0 : index
    %c0_44 = arith.constant 0 : index
    %172 = vector.load %arg11[%c0_43, %c0_44] : memref<16x128xbf16, #tpu.memory_space<vmem>>, vector<16x128xbf16>
    %c0_45 = arith.constant 0 : index
    %c0_46 = arith.constant 0 : index
    %c0_47 = arith.constant 0 : index
    %173 = vector.load %arg3[%c0_45, %c0_46, %c0_47] : memref<1x128x128xbf16, #tpu.memory_space<vmem>>, vector<1x128x128xbf16>
    %174 = vector.shape_cast %173 : vector<1x128x128xbf16> to vector<128x128xbf16>
    %cst_48 = arith.constant dense<0.000000e+00> : vector<16x128xf32>
    %175 = tpu.matmul %172, %174, %cst_48 {dimension_numbers = #tpu.dot_dimension_numbers<[1], [0], [0], [1], [0, 0, 1, 1], [], []>} : vector<16x128xbf16>, vector<128x128xbf16>, vector<16x128xf32> -> vector<16x128xf32>
    %176 = vector.extract_strided_slice %6 {offsets = [5, 0], sizes = [1, 128], strides = [1, 1]} : vector<9x128xf32> to vector<1x128xf32>
    %177 = vector.shape_cast %176 : vector<1x128xf32> to vector<128xf32>
    %178 = vector.shape_cast %177 : vector<128xf32> to vector<1x128xf32>
    %179 = vector.broadcast %178 : vector<1x128xf32> to vector<16x128xf32>
    %180 = arith.addf %175, %179 : vector<16x128xf32>
    %181 = arith.addf %4, %180 : vector<16x128xf32>
    %182 = vector.extract_strided_slice %6 {offsets = [6, 0], sizes = [1, 128], strides = [1, 1]} : vector<9x128xf32> to vector<1x128xf32>
    %183 = vector.shape_cast %182 : vector<1x128xf32> to vector<128xf32>
    %184 = vector.extract_strided_slice %6 {offsets = [7, 0], sizes = [1, 128], strides = [1, 1]} : vector<9x128xf32> to vector<1x128xf32>
    %185 = vector.shape_cast %184 : vector<1x128xf32> to vector<128xf32>
    %cst_49 = arith.constant dense<0.000000e+00> : vector<16xf32>
    %186 = vector.multi_reduction <add>, %181, %cst_49 [1] : vector<16x128xf32> to vector<16xf32>
    %187 = vector.shape_cast %186 : vector<16xf32> to vector<16x1xf32>
    %cst_50 = arith.constant 1.280000e+02 : f32
    %188 = vector.broadcast %cst_50 : f32 to vector<16x1xf32>
    %189 = arith.divf %187, %188 : vector<16x1xf32>
    %190 = vector.broadcast %189 : vector<16x1xf32> to vector<16x128xf32>
    %191 = arith.subf %181, %190 : vector<16x128xf32>
    %192 = arith.mulf %191, %191 : vector<16x128xf32>
    %cst_51 = arith.constant dense<0.000000e+00> : vector<16xf32>
    %193 = vector.multi_reduction <add>, %192, %cst_51 [1] : vector<16x128xf32> to vector<16xf32>
    %194 = vector.shape_cast %193 : vector<16xf32> to vector<16x1xf32>
    %cst_52 = arith.constant 1.280000e+02 : f32
    %195 = vector.broadcast %cst_52 : f32 to vector<16x1xf32>
    %196 = arith.divf %194, %195 : vector<16x1xf32>
    %197 = vector.broadcast %189 : vector<16x1xf32> to vector<16x128xf32>
    %198 = arith.subf %181, %197 : vector<16x128xf32>
    %cst_53 = arith.constant 9.99999974E-6 : f32
    %199 = vector.broadcast %cst_53 : f32 to vector<16x1xf32>
    %200 = arith.addf %196, %199 : vector<16x1xf32>
    %201 = math.rsqrt %200 : vector<16x1xf32>
    %202 = vector.broadcast %201 : vector<16x1xf32> to vector<16x128xf32>
    %203 = arith.mulf %198, %202 : vector<16x128xf32>
    %204 = vector.shape_cast %183 : vector<128xf32> to vector<1x128xf32>
    %205 = vector.broadcast %204 : vector<1x128xf32> to vector<16x128xf32>
    %206 = arith.mulf %203, %205 : vector<16x128xf32>
    %207 = vector.shape_cast %185 : vector<128xf32> to vector<1x128xf32>
    %208 = vector.broadcast %207 : vector<1x128xf32> to vector<16x128xf32>
    %209 = arith.addf %206, %208 : vector<16x128xf32>
    %210 = arith.truncf %209 : vector<16x128xf32> to vector<16x128xbf16>
    %c0_54 = arith.constant 0 : index
    %c0_55 = arith.constant 0 : index
    %c0_56 = arith.constant 0 : index
    %211 = vector.load %arg4[%c0_54, %c0_55, %c0_56] : memref<1x128x512xbf16, #tpu.memory_space<vmem>>, vector<1x128x512xbf16>
    %212 = vector.shape_cast %211 : vector<1x128x512xbf16> to vector<128x512xbf16>
    %cst_57 = arith.constant dense<0.000000e+00> : vector<16x512xf32>
    %213 = tpu.matmul %210, %212, %cst_57 {dimension_numbers = #tpu.dot_dimension_numbers<[1], [0], [0], [1], [0, 0, 1, 1], [], []>} : vector<16x128xbf16>, vector<128x512xbf16>, vector<16x512xf32> -> vector<16x512xf32>
    %c0_58 = arith.constant 0 : index
    %c0_59 = arith.constant 0 : index
    %c0_60 = arith.constant 0 : index
    %214 = vector.load %arg7[%c0_58, %c0_59, %c0_60] : memref<1x1x512xf32, #tpu.memory_space<vmem>>, vector<1x1x512xf32>
    %215 = vector.shape_cast %214 : vector<1x1x512xf32> to vector<512xf32>
    %216 = vector.shape_cast %215 : vector<512xf32> to vector<1x512xf32>
    %217 = vector.broadcast %216 : vector<1x512xf32> to vector<16x512xf32>
    %218 = arith.addf %213, %217 : vector<16x512xf32>
    %cst_61 = arith.constant 5.000000e-01 : f32
    %219 = vector.broadcast %cst_61 : f32 to vector<16x512xf32>
    %220 = arith.mulf %219, %218 : vector<16x512xf32>
    %cst_62 = arith.constant 0.707106769 : f32
    %221 = vector.broadcast %cst_62 : f32 to vector<16x512xf32>
    %222 = arith.mulf %218, %221 : vector<16x512xf32>
    %223 = math.absf %222 : vector<16x512xf32>
    %cst_63 = arith.constant 5.000000e-01 : f32
    %224 = vector.broadcast %cst_63 : f32 to vector<16x512xf32>
    %225 = arith.mulf %224, %223 : vector<16x512xf32>
    %cst_64 = arith.constant 1.000000e+00 : f32
    %226 = vector.broadcast %cst_64 : f32 to vector<16x512xf32>
    %227 = arith.addf %226, %225 : vector<16x512xf32>
    %cst_65 = arith.constant 1.000000e+00 : f32
    %228 = vector.broadcast %cst_65 : f32 to vector<16x512xf32>
    %229 = arith.divf %228, %227 : vector<16x512xf32>
    %cst_66 = arith.constant 0.000000e+00 : f32
    %230 = vector.broadcast %cst_66 : f32 to vector<16x512xf32>
    %231 = arith.subf %230, %223 : vector<16x512xf32>
    %232 = arith.mulf %231, %223 : vector<16x512xf32>
    %cst_67 = arith.constant 1.26551223 : f32
    %233 = vector.broadcast %cst_67 : f32 to vector<16x512xf32>
    %234 = arith.subf %232, %233 : vector<16x512xf32>
    %cst_68 = arith.constant 0.170872763 : f32
    %235 = vector.broadcast %cst_68 : f32 to vector<16x512xf32>
    %236 = arith.mulf %229, %235 : vector<16x512xf32>
    %cst_69 = arith.constant -0.822152256 : f32
    %237 = vector.broadcast %cst_69 : f32 to vector<16x512xf32>
    %238 = arith.addf %237, %236 : vector<16x512xf32>
    %239 = arith.mulf %229, %238 : vector<16x512xf32>
    %cst_70 = arith.constant 1.48851585 : f32
    %240 = vector.broadcast %cst_70 : f32 to vector<16x512xf32>
    %241 = arith.addf %240, %239 : vector<16x512xf32>
    %242 = arith.mulf %229, %241 : vector<16x512xf32>
    %cst_71 = arith.constant -1.13520396 : f32
    %243 = vector.broadcast %cst_71 : f32 to vector<16x512xf32>
    %244 = arith.addf %243, %242 : vector<16x512xf32>
    %245 = arith.mulf %229, %244 : vector<16x512xf32>
    %cst_72 = arith.constant 0.278868079 : f32
    %246 = vector.broadcast %cst_72 : f32 to vector<16x512xf32>
    %247 = arith.addf %246, %245 : vector<16x512xf32>
    %248 = arith.mulf %229, %247 : vector<16x512xf32>
    %cst_73 = arith.constant -0.186288059 : f32
    %249 = vector.broadcast %cst_73 : f32 to vector<16x512xf32>
    %250 = arith.addf %249, %248 : vector<16x512xf32>
    %251 = arith.mulf %229, %250 : vector<16x512xf32>
    %cst_74 = arith.constant 0.0967841818 : f32
    %252 = vector.broadcast %cst_74 : f32 to vector<16x512xf32>
    %253 = arith.addf %252, %251 : vector<16x512xf32>
    %254 = arith.mulf %229, %253 : vector<16x512xf32>
    %cst_75 = arith.constant 0.374091953 : f32
    %255 = vector.broadcast %cst_75 : f32 to vector<16x512xf32>
    %256 = arith.addf %255, %254 : vector<16x512xf32>
    %257 = arith.mulf %229, %256 : vector<16x512xf32>
    %cst_76 = arith.constant 1.00002372 : f32
    %258 = vector.broadcast %cst_76 : f32 to vector<16x512xf32>
    %259 = arith.addf %258, %257 : vector<16x512xf32>
    %260 = arith.mulf %229, %259 : vector<16x512xf32>
    %261 = arith.addf %234, %260 : vector<16x512xf32>
    %262 = math.exp %261 : vector<16x512xf32>
    %263 = arith.mulf %229, %262 : vector<16x512xf32>
    %cst_77 = arith.constant 1.000000e+00 : f32
    %264 = vector.broadcast %cst_77 : f32 to vector<16x512xf32>
    %265 = arith.subf %264, %263 : vector<16x512xf32>
    %cst_78 = arith.constant 0.000000e+00 : f32
    %266 = vector.broadcast %cst_78 : f32 to vector<16x512xf32>
    %267 = arith.cmpf oge, %222, %266 : vector<16x512xf32>
    %cst_79 = arith.constant 0.000000e+00 : f32
    %268 = vector.broadcast %cst_79 : f32 to vector<16x512xf32>
    %269 = arith.subf %268, %265 : vector<16x512xf32>
    %270 = arith.select %267, %265, %269 : vector<16x512xi1>, vector<16x512xf32>
    %cst_80 = arith.constant 1.000000e+00 : f32
    %271 = vector.broadcast %cst_80 : f32 to vector<16x512xf32>
    %272 = arith.addf %271, %270 : vector<16x512xf32>
    %273 = arith.mulf %220, %272 : vector<16x512xf32>
    %274 = arith.truncf %273 : vector<16x512xf32> to vector<16x512xbf16>
    %c0_81 = arith.constant 0 : index
    %c0_82 = arith.constant 0 : index
    %c0_83 = arith.constant 0 : index
    %275 = vector.load %arg5[%c0_81, %c0_82, %c0_83] : memref<1x512x128xbf16, #tpu.memory_space<vmem>>, vector<1x512x128xbf16>
    %276 = vector.shape_cast %275 : vector<1x512x128xbf16> to vector<512x128xbf16>
    %cst_84 = arith.constant dense<0.000000e+00> : vector<16x128xf32>
    %277 = tpu.matmul %274, %276, %cst_84 {dimension_numbers = #tpu.dot_dimension_numbers<[1], [0], [0], [1], [0, 0, 1, 1], [], []>} : vector<16x512xbf16>, vector<512x128xbf16>, vector<16x128xf32> -> vector<16x128xf32>
    %278 = vector.extract_strided_slice %6 {offsets = [8, 0], sizes = [1, 128], strides = [1, 1]} : vector<9x128xf32> to vector<1x128xf32>
    %279 = vector.shape_cast %278 : vector<1x128xf32> to vector<128xf32>
    %280 = vector.shape_cast %279 : vector<128xf32> to vector<1x128xf32>
    %281 = vector.broadcast %280 : vector<1x128xf32> to vector<16x128xf32>
    %282 = arith.addf %277, %281 : vector<16x128xf32>
    %283 = arith.addf %181, %282 : vector<16x128xf32>
    %284 = vector.shape_cast %283 : vector<16x128xf32> to vector<2x8x128xf32>
    %c0_85 = arith.constant 0 : index
    %c0_86 = arith.constant 0 : index
    %c0_87 = arith.constant 0 : index
    %285 = vector.load %arg10[%c0_85, %c0_86, %c0_87] : memref<2x8x128xf32, #tpu.memory_space<vmem>>, vector<2x8x128xf32>
    tpu.vector_store %arg10[%c0_85, %c0_86, %c0_87], %284 {strides = array<i32>} : memref<2x8x128xf32, #tpu.memory_space<vmem>>, vector<2x8x128xf32>,
    %c1_i32 = arith.constant 1 : i32
    %286 = arith.cmpi eq, %arg0, %c1_i32 : i32
    %287 = arith.extui %286 : i1 to i32
    %c0_i32_88 = arith.constant 0 : i32
    %288 = arith.cmpi ne, %287, %c0_i32_88 : i32
    scf.if %288 {
      %c0_89 = arith.constant 0 : index
      %c0_90 = arith.constant 0 : index
      %289 = vector.load %arg8[%c0_89, %c0_90] : memref<1x128xf32, #tpu.memory_space<vmem>>, vector<1x128xf32>
      %290 = vector.shape_cast %289 : vector<1x128xf32> to vector<128xf32>
      %c0_91 = arith.constant 0 : index
      %c0_92 = arith.constant 0 : index
      %291 = vector.load %arg9[%c0_91, %c0_92] : memref<1x128xf32, #tpu.memory_space<vmem>>, vector<1x128xf32>
      %292 = vector.shape_cast %291 : vector<1x128xf32> to vector<128xf32>
      %cst_93 = arith.constant dense<0.000000e+00> : vector<16xf32>
      %293 = vector.multi_reduction <add>, %283, %cst_93 [1] : vector<16x128xf32> to vector<16xf32>
      %294 = vector.shape_cast %293 : vector<16xf32> to vector<16x1xf32>
      %cst_94 = arith.constant 1.280000e+02 : f32
      %295 = vector.broadcast %cst_94 : f32 to vector<16x1xf32>
      %296 = arith.divf %294, %295 : vector<16x1xf32>
      %297 = vector.broadcast %296 : vector<16x1xf32> to vector<16x128xf32>
      %298 = arith.subf %283, %297 : vector<16x128xf32>
      %299 = arith.mulf %298, %298 : vector<16x128xf32>
      %cst_95 = arith.constant dense<0.000000e+00> : vector<16xf32>
      %300 = vector.multi_reduction <add>, %299, %cst_95 [1] : vector<16x128xf32> to vector<16xf32>
      %301 = vector.shape_cast %300 : vector<16xf32> to vector<16x1xf32>
      %cst_96 = arith.constant 1.280000e+02 : f32
      %302 = vector.broadcast %cst_96 : f32 to vector<16x1xf32>
      %303 = arith.divf %301, %302 : vector<16x1xf32>
      %304 = vector.broadcast %296 : vector<16x1xf32> to vector<16x128xf32>
      %305 = arith.subf %283, %304 : vector<16x128xf32>
      %cst_97 = arith.constant 9.99999974E-6 : f32
      %306 = vector.broadcast %cst_97 : f32 to vector<16x1xf32>
      %307 = arith.addf %303, %306 : vector<16x1xf32>
      %308 = math.rsqrt %307 : vector<16x1xf32>
      %309 = vector.broadcast %308 : vector<16x1xf32> to vector<16x128xf32>
      %310 = arith.mulf %305, %309 : vector<16x128xf32>
      %311 = vector.shape_cast %290 : vector<128xf32> to vector<1x128xf32>
      %312 = vector.broadcast %311 : vector<1x128xf32> to vector<16x128xf32>
      %313 = arith.mulf %310, %312 : vector<16x128xf32>
      %314 = vector.shape_cast %292 : vector<128xf32> to vector<1x128xf32>
      %315 = vector.broadcast %314 : vector<1x128xf32> to vector<16x128xf32>
      %316 = arith.addf %313, %315 : vector<16x128xf32>
      %317 = vector.shape_cast %316 : vector<16x128xf32> to vector<2x8x128xf32>
      %c0_98 = arith.constant 0 : index
      %c0_99 = arith.constant 0 : index
      %c0_100 = arith.constant 0 : index
      %318 = vector.load %arg10[%c0_98, %c0_99, %c0_100] : memref<2x8x128xf32, #tpu.memory_space<vmem>>, vector<2x8x128xf32>
      tpu.vector_store %arg10[%c0_98, %c0_99, %c0_100], %317 {strides = array<i32>} : memref<2x8x128xf32, #tpu.memory_space<vmem>>, vector<2x8x128xf32>,
    } else {
    }
    return
  }
  func.func @transform_0(%arg0: i32) -> (i32, i32, i32) {
    %c0_i32 = arith.constant 0 : i32
    %c0_i32_0 = arith.constant 0 : i32
    %c0_i32_1 = arith.constant 0 : i32
    %c0_i32_2 = arith.constant 0 : i32
    return %c0_i32, %c0_i32_0, %c0_i32_1 : i32, i32, i32
  }
  func.func @transform_1(%arg0: i32) -> (i32, i32, i32) {
    %c0_i32 = arith.constant 0 : i32
    %c0_i32_0 = arith.constant 0 : i32
    %c0_i32_1 = arith.constant 0 : i32
    return %arg0, %c0_i32, %c0_i32_0 : i32, i32, i32
  }
  func.func @transform_2(%arg0: i32) -> (i32, i32, i32) {
    %c0_i32 = arith.constant 0 : i32
    %c0_i32_0 = arith.constant 0 : i32
    %c0_i32_1 = arith.constant 0 : i32
    return %arg0, %c0_i32, %c0_i32_0 : i32, i32, i32
  }
  func.func @transform_3(%arg0: i32) -> (i32, i32, i32) {
    %c0_i32 = arith.constant 0 : i32
    %c0_i32_0 = arith.constant 0 : i32
    %c0_i32_1 = arith.constant 0 : i32
    return %arg0, %c0_i32, %c0_i32_0 : i32, i32, i32
  }
  func.func @transform_4(%arg0: i32) -> (i32, i32, i32) {
    %c0_i32 = arith.constant 0 : i32
    %c0_i32_0 = arith.constant 0 : i32
    %c0_i32_1 = arith.constant 0 : i32
    return %arg0, %c0_i32, %c0_i32_0 : i32, i32, i32
  }
  func.func @transform_5(%arg0: i32) -> (i32, i32, i32) {
    %c0_i32 = arith.constant 0 : i32
    %c0_i32_0 = arith.constant 0 : i32
    %c0_i32_1 = arith.constant 0 : i32
    return %arg0, %c0_i32, %c0_i32_0 : i32, i32, i32
  }
  func.func @transform_6(%arg0: i32) -> (i32, i32, i32) {
    %c0_i32 = arith.constant 0 : i32
    %c0_i32_0 = arith.constant 0 : i32
    %c0_i32_1 = arith.constant 0 : i32
    return %arg0, %c0_i32, %c0_i32_0 : i32, i32, i32
  }
  func.func @transform_7(%arg0: i32) -> (i32, i32) {
    %c0_i32 = arith.constant 0 : i32
    %c0_i32_0 = arith.constant 0 : i32
    %c0_i32_1 = arith.constant 0 : i32
    return %c0_i32, %c0_i32_0 : i32, i32
  }
  func.func @transform_8(%arg0: i32) -> (i32, i32) {
    %c0_i32 = arith.constant 0 : i32
    %c0_i32_0 = arith.constant 0 : i32
    %c0_i32_1 = arith.constant 0 : i32
    return %c0_i32, %c0_i32_0 : i32, i32
  }
  func.func @transform_9(%arg0: i32) -> (i32, i32, i32) {
    %c0_i32 = arith.constant 0 : i32
    %c0_i32_0 = arith.constant 0 : i32
    %c0_i32_1 = arith.constant 0 : i32
    %c0_i32_2 = arith.constant 0 : i32
    return %c0_i32, %c0_i32_0, %c0_i32_1 : i32, i32, i32
  }
}

</mosaic_0001>

<bundles_post_ra>
// kernel: tpu_custom_call.1
= control target key start
LH: loop header
LB: loop body
LE: loop exit
PB: predicated region body
PF: predicated region fallthrough
CT: control target
= control target key end

     0   :  { %s4819_s0 = inlined_call_operand.vmem [shape: f32[2,8,128], index: 0, kind: input, shape index: {}]   ;;  %s4820_s1 = inlined_call_operand.hbm [shape: bf16[2,128,384], index: 1, kind: input, shape index: {}]   ;;  %s4821_s2 = inlined_call_operand.hbm [shape: bf16[2,128,128], index: 2, kind: input, shape index: {}]   ;;  %s4822_s3 = inlined_call_operand.hbm [shape: bf16[2,128,512], index: 3, kind: input, shape index: {}]   ;;  %s4823_s4 = inlined_call_operand.hbm [shape: bf16[2,512,128], index: 4, kind: input, shape index: {}]   ;;  %s4824_s5 = inlined_call_operand.vmem [shape: f32[2,9,128], index: 5, kind: input, shape index: {}]   ;;  %s4825_s6 = inlined_call_operand.vmem [shape: f32[2,1,512], index: 6, kind: input, shape index: {}]   ;;  %s4826_s7 = inlined_call_operand.vmem [shape: f32[1,128], index: 7, kind: input, shape index: {}]   ;;  %s4827_s8 = inlined_call_operand.vmem [shape: f32[1,128], index: 8, kind: input, shape index: {}]   ;;  %s4828_s9 = inlined_call_operand.hbm [shape: f32[2,8,128], index: 9, kind: output, shape index: {}]  }
   0x1   :  { %4833 = sst [smem:[#allocation18_spill]] %s4820_s1 }
   0x2   :  { %4834 = sst [smem:[#allocation19_spill]] %s4821_s2 }
   0x3   :  { %14 = vsyncpa [#allocation4], 0 }
   0x4   :  { %16 = vsyncpa [#allocation4 + $0x1], 0 }
   0x5   :  { %17 = vsyncpa [#allocation7], 0 }
   0x6   :  { %19 = vsyncpa [#allocation7 + $0x1], 0 }
   0x7   :  { %20 = vsyncpa [#allocation10], 0 }
   0x8   :  { %22 = vsyncpa [#allocation10 + $0x1], 0 }
   0x9   :  { %23 = vsyncpa [#allocation5], 0  ;;  %s3961_s30 = smov 0   ;;  %s3963_s10 = smov 0  }
   0xa   :  { %s3965_s11 = smov 0   ;;  %s3967_s12 = smov 0  }
   0xb LB: > { %4835 = sst [smem:[#allocation16_spill]] %s3886_s11  ;;  %s3980_s13 = sadd.s32 4294967295, %s3890_s12   ;;  %s3890_s12 = sphi %s3967_s12, %s4853_s12   ;;  %s3886_s11 = sphi %s3965_s11, %s4850_s11   ;;  %s3882_s10 = sphi %s3963_s10, %s4852_s10   ;;  %s3878_s30 = sphi %s3961_s30, %s4851_s30  }
   0xc   : > { %s3983_s14 = sadd.s32 1, %s3890_s12   ;;  %s57_s16 = sadd.s32 1, %s3886_s11 }
   0xd   : > { %s54_s15 = ssub.s32 %s3890_s12, %s3983_s14  ;;  %p64_p1 = scmp.ne.s32.totalorder %s3886_s11, %s3882_s10 }
   0xe   : > { %p55_p0 = scmp.eq.s32.totalorder %s54_s15, 0  ;;  %p65_p2 = scmp.eq.s32.totalorder %s3890_s12, 0 }
   0xf   : > { %p70_p3 = scmp.ne.s32.totalorder %s3882_s10, %s3878_s30  ;;  %p71_p5 = scmp.eq.s32.totalorder %s3980_s13, 0 }
  0x10   : > { %s3993_s17 = scalar_select %p55_p0, %s3886_s11, %s57_s16  }
  0x11   : > { %p66_p4 = por %p65_p2, %p64_p1  ;;  %p3450_p6 = scmp.lt.s32.totalorder %s3890_s12, 2 }
  0x12   : > { %4836 = sst [smem:[#allocation17_spill]] %s3993_s17  ;;  %p3997_p7 = por %p71_p5, %p70_p3 }
  0x13   : > { %s4002_s19 = sand.u32 1, %s3886_s11   ;;  %p4004_p8 = pnand %p3450_p6, %p66_p4 }
  0x14   : > { %s4837_s18 = scalar_select %p3997_p7, 1, 0 }
  0x15   : > { %s317_s21 = sand.u32 1, %s3890_s12   ;;  %s3031_s22 = sshll.u32 %s4002_s19, 6 }
  0x16   : > { %s3182_s23 = sshll.u32 %s3890_s12, 10  ;;  %s321_s24 = scalar_lea.vmem [#allocation6], %s3031_s22 }
  0x17   : > { %s328_s25 = sshll.u32 %s321_s24, 4  ;;  %s4839_s2 = sld [smem:[#allocation19_spill]]  ;;  %s4016_s25 = int_to_ptr.vmem [resolvable:$true] %s328_s25 }
  0x18   : > { %s4018_s29 = scalar_lea.sflag [#allocation7], %s317_s21  ;;  %p4024_p10 = pneg %p4004_p8 }
  0x1d   : > { %s4014_s28 = scalar_lea.hbm %s4839_s2, %s3182_s23  ;;  %s3703_s23 = scalar_lea.hbm %s4839_s2, 2048 }
  0x1e   : > { %s3698_s30 = scalar_lea.hbm %s4014_s28, 1024  ;;  %p3704_p13 = scmp.lt.u32.totalorder %s4014_s28, %s4839_s2 }
  0x1f   : > { %p3699_p9 = scmp.ne.s32.totalorder %s4014_s28, %s3698_s30  ;;  %p3705_p0 = scmp.lt.u32.totalorder %s3703_s23, %s3698_s30 }
  0x20   : > { %p3707_p2 = scmp.lt.u32.totalorder %s3698_s30, %s4014_s28 }
  0x21   : > { %p3701_p11 = pnand %p4024_p10, %p3699_p9  ;;  %p3706_p1 = por %p3705_p0, %p3704_p13 }
  0x23   : > { %p3702_p12 = pneg %p3701_p11  ;;  %p3708_p3 = por %p3707_p2, %p3706_p1 }
  0x25   : > { %p3709_p4 = pnand %p3708_p3, %p3702_p12 }
  0x27   : > { %3712 = shalt.err (!%p3709_p4)
}
  0x28   : > { %s3713_s21 = scalar_lea.vmem %s4016_s25, 1024  ;;  %s3892_s27 = smov [#allocation6]  }
  0x29   : > { %p3714_p5 = scmp.ne.s32.totalorder %s4016_s25, %s3713_s21  ;;  %s3718_s16 = sshll.u32 %s3892_s27, 4  ;;  %s3719_s16 = int_to_ptr.vmem [resolvable:$false] %s3718_s16 }
  0x2a   : > { %s3720_s22 = scalar_lea.vmem %s3719_s16, 2048  ;;  %p3721_p11 = scmp.lt.s32.totalorder %s4016_s25, %s3719_s16 }
  0x2b   : > { %p3716_p6 = pnand %p3714_p5, %p4024_p10  ;;  %p3722_p7 = scmp.lt.s32.totalorder %s3720_s22, %s3713_s21 }
  0x2d   : > { %p3717_p9 = pneg %p3716_p6  ;;  %p3723_p13 = por %p3722_p7, %p3721_p11 }
  0x2f   : > { %p3724_p0 = pnand %p3723_p13, %p3717_p9 }
  0x31   : > { %3727 = shalt.err (!%p3724_p0)
}
  0x32   : > { %s4830_s30 = smov 64   ;;  %s4831_s23 = smov 4  }
  0x33   : > { %3443 = dma.hbm_to_vmem [thread:$0]  (!%p4004_p8), %s4014_s28, 1024, %s4016_s25, %s4018_s29, %s4830_s30, %s4830_s30, %s4831_s23  }
  0x34   : > { %p3040_p7 = scmp.ge.s32.totalorder %s3890_s12, 1  ;;  %p393_p12 = scmp.lt.s32.totalorder %s3890_s12, 3 }
  0x35   : > { %s3422_s24 = smul.u32 192, %s4002_s19  ;;  %s4842_s1 = sld [smem:[#allocation18_spill]] }
  0x36   : > { %p4054_p1 = pnand %p3040_p7, %p393_p12  ;;  %s3423_s21 = smul.u32 3072, %s3890_s12 }
  0x37   : > { %s300_s2 = scalar_lea.vmem [#allocation3], %s3422_s24  ;;  %s297_s25 = scalar_lea.sflag [#allocation4], %s4002_s19 }
  0x38   : > { %s4841_s26 = scalar_select %p4054_p1, 1, 0 }
  0x39   : > { %s307_s17 = sshll.u32 %s300_s2, 4  ;;  %s4064_s17 = int_to_ptr.vmem [resolvable:$true] %s307_s17 }
  0x3b   : > { %s4062_s22 = scalar_lea.hbm %s4842_s1, %s3423_s21  ;;  %s3733_s27 = scalar_lea.hbm %s4842_s1, 6144 }
  0x3c   : > { %s3728_s28 = scalar_lea.hbm %s4062_s22, 3072  ;;  %p3734_p5 = scmp.lt.u32.totalorder %s4062_s22, %s4842_s1 }
  0x3d   : > { %p3729_p2 = scmp.ne.s32.totalorder %s4062_s22, %s3728_s28  ;;  %p3735_p6 = scmp.lt.u32.totalorder %s3733_s27, %s3728_s28 }
  0x3e   : > { %p3737_p11 = scmp.lt.u32.totalorder %s3728_s28, %s4062_s22 }
  0x3f   : > { %p3731_p3 = pnand %p3729_p2, %p4024_p10  ;;  %p3736_p9 = por %p3735_p6, %p3734_p5 }
  0x41   : > { %p3732_p4 = pneg %p3731_p3  ;;  %p3738_p13 = por %p3737_p11, %p3736_p9 }
  0x43   : > { %p3739_p0 = pnand %p3738_p13, %p3732_p4 }
  0x45   : > { %3742 = shalt.err (!%p3739_p0)
}
  0x46   : > { %s3743_s2 = scalar_lea.vmem %s4064_s17, 3072  ;;  %s3895_s30 = smov [#allocation3]  }
  0x47   : > { %p3744_p7 = scmp.ne.s32.totalorder %s4064_s17, %s3743_s2  ;;  %s3748_s23 = sshll.u32 %s3895_s30, 4  ;;  %s3749_s23 = int_to_ptr.vmem [resolvable:$false] %s3748_s23 }
  0x48   : > { %s3750_s24 = scalar_lea.vmem %s3749_s23, 6144  ;;  %p3751_p3 = scmp.lt.s32.totalorder %s4064_s17, %s3749_s23 }
  0x49   : > { %p3746_p12 = pnand %p3744_p7, %p4024_p10  ;;  %p3752_p1 = scmp.lt.s32.totalorder %s3750_s24, %s3743_s2 }
  0x4b   : > { %p3747_p2 = pneg %p3746_p12  ;;  %p3753_p5 = por %p3752_p1, %p3751_p3 }
  0x4d   : > { %p3754_p6 = pnand %p3753_p5, %p3747_p2 }
  0x4f   : > { %3757 = shalt.err (!%p3754_p6)
}
  0x50   : > { %s3896_s28 = smov 192   ;;  %s3897_s27 = smov 12  }
  0x51   : > { %3440 = dma.hbm_to_vmem [thread:$0]  (!%p4004_p8), %s4062_s22, 3072, %s4064_s17, %s297_s25, %s3896_s28, %s3896_s28, %s3897_s27  }
  0x52   : > { %s3034_s21 = sshll.u32 %s4002_s19, 8  ;;  %s3183_s16 = sshll.u32 %s3890_s12, 12 }
  0x53   : > { %s4097_s23 = scalar_lea.hbm %s4822_s3, %s3183_s16  ;;  %s342_s24 = scalar_lea.vmem [#allocation8], %s3034_s21 }
  0x54   : > { %s349_s1 = sshll.u32 %s342_s24, 4  ;;  %s3758_s11 = scalar_lea.hbm %s4097_s23, 4096  ;;  %s4101_s1 = int_to_ptr.vmem [resolvable:$true] %s349_s1 }
  0x55   : > { %p3759_p1 = scmp.ne.s32.totalorder %s4097_s23, %s3758_s11  ;;  %s3763_s25 = scalar_lea.hbm %s4822_s3, 8192 }
  0x56   : > { %p3764_p11 = scmp.lt.u32.totalorder %s4097_s23, %s4822_s3  ;;  %p3765_p13 = scmp.lt.u32.totalorder %s3763_s25, %s3758_s11 }
  0x57   : > { %p3761_p4 = pnand %p3759_p1, %p4024_p10  ;;  %p3767_p7 = scmp.lt.u32.totalorder %s3758_s11, %s4097_s23 }
  0x58   : > { %p3766_p0 = por %p3765_p13, %p3764_p11 }
  0x59   : > { %p3762_p9 = pneg %p3761_p4 }
  0x5a   : > { %p3768_p12 = por %p3767_p7, %p3766_p0 }
  0x5c   : > { %p3769_p2 = pnand %p3768_p12, %p3762_p9 }
  0x5e   : > { %3772 = shalt.err (!%p3769_p2)
}
  0x5f   : > { %s3773_s2 = scalar_lea.vmem %s4101_s1, 4096  ;;  %s3898_s30 = smov [#allocation8]  }
  0x60   : > { %p3774_p3 = scmp.ne.s32.totalorder %s4101_s1, %s3773_s2  ;;  %s3778_s24 = sshll.u32 %s3898_s30, 4  ;;  %s3779_s24 = int_to_ptr.vmem [resolvable:$false] %s3778_s24 }
  0x61   : > { %s3780_s17 = scalar_lea.vmem %s3779_s24, 8192  ;;  %p3781_p1 = scmp.lt.s32.totalorder %s4101_s1, %s3779_s24 }
  0x62   : > { %p3776_p5 = pnand %p3774_p3, %p4024_p10  ;;  %p3782_p4 = scmp.lt.s32.totalorder %s3780_s17, %s3773_s2 }
  0x64   : > { %p3777_p6 = pneg %p3776_p5  ;;  %p3783_p11 = por %p3782_p4, %p3781_p1 }
  0x66   : > { %p3784_p13 = pnand %p3783_p11, %p3777_p6 }
  0x68   : > { %3787 = shalt.err (!%p3784_p13)
}
  0x69   : > { %s3899_s11 = smov 256   ;;  %s3900_s22 = smov 16  }
  0x6a   : > { %3446 = dma.hbm_to_vmem [thread:$0]  (!%p4004_p8), %s4097_s23, 4096, %s4101_s1, %s4018_s29, %s3899_s11, %s3899_s11, %s3900_s22  }
  0x6b   : > { %s4130_s27 = scalar_lea.hbm %s4823_s4, %s3183_s16  ;;  %s363_s2 = scalar_lea.vmem [#allocation9], %s3034_s21 }
  0x6c   : > { %s370_s30 = sshll.u32 %s363_s2, 4  ;;  %s360_s24 = scalar_lea.sflag [#allocation10], %s4002_s19  ;;  %s4134_s30 = int_to_ptr.vmem [resolvable:$true] %s370_s30 }
  0x6d   : > { %s3788_s17 = scalar_lea.hbm %s4130_s27, 4096  ;;  %s3793_s29 = scalar_lea.hbm %s4823_s4, 8192 }
  0x6e   : > { %p3789_p9 = scmp.ne.s32.totalorder %s4130_s27, %s3788_s17  ;;  %p3794_p12 = scmp.lt.u32.totalorder %s4130_s27, %s4823_s4 }
  0x6f   : > { %p3795_p2 = scmp.lt.u32.totalorder %s3793_s29, %s3788_s17  ;;  %p3797_p5 = scmp.lt.u32.totalorder %s3788_s17, %s4130_s27 }
  0x70   : > { %p3791_p0 = pnand %p3789_p9, %p4024_p10 }
  0x71   : > { %p3796_p3 = por %p3795_p2, %p3794_p12 }
  0x72   : > { %p3792_p7 = pneg %p3791_p0 }
  0x73   : > { %p3798_p6 = por %p3797_p5, %p3796_p3 }
  0x75   : > { %p3799_p1 = pnand %p3798_p6, %p3792_p7 }
  0x77   : > { %3802 = shalt.err (!%p3799_p1)
}
  0x78   : > { %s3803_s21 = scalar_lea.vmem %s4134_s30, 4096  ;;  %s3901_s11 = smov [#allocation9]  }
  0x79   : > { %p3804_p4 = scmp.ne.s32.totalorder %s4134_s30, %s3803_s21  ;;  %s3808_s22 = sshll.u32 %s3901_s11, 4  ;;  %s3809_s22 = int_to_ptr.vmem [resolvable:$false] %s3808_s22 }
  0x7a   : > { %s3810_s25 = scalar_lea.vmem %s3809_s22, 8192  ;;  %p3811_p9 = scmp.lt.s32.totalorder %s4134_s30, %s3809_s22 }
  0x7b   : > { %p3806_p11 = pnand %p3804_p4, %p4024_p10  ;;  %p3812_p0 = scmp.lt.s32.totalorder %s3810_s25, %s3803_s21 }
  0x7d   : > { %p3807_p13 = pneg %p3806_p11  ;;  %p3813_p12 = por %p3812_p0, %p3811_p9 }
  0x7f   : > { %p3814_p2 = pnand %p3813_p12, %p3807_p13 }
  0x81   : > { %3817 = shalt.err (!%p3814_p2)
}
  0x82   : > { %s4843_s28 = smov 4   ;;  %s4844_s2 = smov 64  }
  0x83   : > { %3449 = dma.hbm_to_vmem [thread:$0]  (!%p4004_p8), %s4130_s27, 4096, %s4134_s30, %s360_s24, %s4844_s2, %s4844_s2, %s4843_s28  }
  0x84   : > { %p4845_p10 = scmp.ne.s32.totalorder %s4841_s26, 0 }
  0x85   : > { %s399_s15 = sand.u32 (!%p4845_p10), 1, %s3882_s10   ;;  %p4846_p7 = scmp.ne.s32.totalorder (!%p4845_p10), %s4837_s18, 0 }
  0x86   : > { %397 = sbr.rel (%p4845_p10) target bundleno = 4601 (0x11f9), region = 56  ;;  %s400_s1 = scalar_lea.sflag (!%p4845_p10), [#allocation4], %s399_s15 }
  0x87   : > { %s3424_s17 = smul.u32 (!%p4845_p10), 192, %s399_s15 }
  0x89   : > { %s4166_s12 = scalar_lea.vmem (!%p4845_p10), [#allocation3], %s3424_s17 }
  0x8d   : > { %3861 = dma.done.wait (%p4846_p7), %s400_s1, 3072  }
  0x8e   : > { %3863 = vsyncadd (%p4846_p7), %s400_s1, 4294964224  ;;  %s408_s19 = sand.u32 1, %s3980_s13   ;;  %s3041_s20 = sshll.u32 %s399_s15, 6 }
  0x8f   : > { %s409_s27 = scalar_lea.sflag [#allocation7], %s408_s19  ;;  %s4173_s30 = scalar_lea.vmem [#allocation6], %s3041_s20 }
  0x90   : > { %3865 = dma.done.wait (%p4846_p7), %s409_s27, 5120  }
  0x91   : > { %3867 = vsyncadd (%p4846_p7), %s409_s27, 4294962176  ;;  %s3042_s26 = sshll.u32 %s399_s15, 8  ;;  %s427_s29 = scalar_lea.sflag [#allocation10], %s399_s15 }
  0x92   : > { %s4179_s24 = scalar_lea.vmem [#allocation8], %s3042_s26  ;;  %s4181_s16 = scalar_lea.vmem [#allocation9], %s3042_s26 }
  0x93   : > { %3869 = dma.done.wait (%p4846_p7), %s427_s29, 4096  }
  0x94   : > { %3871 = vsyncadd (%p4846_p7), %s427_s29, 4294963200  ;;  %p484_p8 = scmp.lt.s32.totalorder %s3980_s13, 1  ;;  %p3047_p3 = scmp.ne.s32.totalorder %s3980_s13, 0 }
  0x95   : > { %v498_v0 = vld [vmem:[%s4819_s0] sm:$0xff] (!%p3047_p3)  ;;  %v499_v1 = vld [vmem:[%s4819_s0 + $0x8] sm:$0xff] (!%p3047_p3) }
  0x96   : > { %s485_s23 = scalar_select %p484_p8, %s3980_s13, 1 }
  0x97   : > { %497 = sbr.rel (%p3047_p3) target bundleno = 158 (0x9e), region = 76  ;;  %500 = vst [vmem:[#allocation11] sm:$0xff] (!%p3047_p3), %v498_v0  ;;  %501 = vst [vmem:[#allocation11 + $0x8] sm:$0xff] (!%p3047_p3), %v499_v1 }
  0x98   : > { %s3185_s21 = sshll.u32 %s485_s23, 4  ;;  %s3046_s11 = sshll.u32 %s485_s23, 2 }
  0x99   : > { %s4192_s28 = scalar_lea.vmem %s4824_s5, %s3185_s21  ;;  %s4197_s17 = scalar_lea.vmem %s4825_s6, %s3046_s11 }
  0x9e PF: > { %v502_v2 = vld [vmem:[#allocation11] sm:$0xff]  ;;  %v503_v3 = vld [vmem:[#allocation11 + $0x8] sm:$0xff]  ;;  %v3902_v6 = vmov 0.0   ;;  %v3510_v20 = vld [vmem:[%s4166_s12 + $0x30] ss:$12 sps:$4 sm:$0xff]   ;;  %v3903_v32 = vmov 0   ;;  %v529_v42 = vlaneseq }
  0x9f   : > { %506 = vadd.xlane.f32.xlu0 %v502_v2  ;;  %v3500_v4 = vld [vmem:[%s4166_s12 + $0x4] ss:$12 sps:$4 sm:$0xff]   ;;  %v3502_v5 = vld [vmem:[%s4166_s12] ss:$12 sps:$4 sm:$0xff]   ;;  %3286 = vmatprep.subr.bf16.mxu1 %v3902_v6  ;;  %v3503_v7 = vld [vmem:[%s4166_s12 + $0x8] ss:$12 sps:$4 sm:$0xff]  }
  0xa0   : > { %v3504_v8 = vld [vmem:[%s4166_s12 + $0x1c] ss:$12 sps:$4 sm:$0xff]   ;;  %702 = vmatprep.subr.bf16.mxu0 %v3500_v4  ;;  %3287 = vmatpush3.bf16.msra.mxu1 %v3503_v7  ;;  %v3506_v17 = vld [vmem:[%s4166_s12 + $0x18] ss:$12 sps:$4 sm:$0xff]   ;;  %v3507_v18 = vld [vmem:[%s4166_s12 + $0x20] ss:$12 sps:$4 sm:$0xff]  }
  0xa1   : > { %703 = vmatpush1.bf16.msra.mxu0 %v3502_v5  ;;  %3288 = vmatprep.subr.bf16.mxu1 %v3902_v6  ;;  %v3508_v19 = vld [vmem:[%s4166_s12 + $0x34] ss:$12 sps:$4 sm:$0xff]   ;;  %v3511_v21 = vld [vmem:[%s4166_s12 + $0x38] ss:$12 sps:$4 sm:$0xff]   ;;  %v3515_v24 = vld [vmem:[%s4166_s12 + $0x50] ss:$12 sps:$4 sm:$0xff]  }
  0xa2   : > { %704 = vmatprep.subr.bf16.mxu0 %v3504_v8  ;;  %v3512_v22 = vld [vmem:[%s4166_s12 + $0x4c] ss:$12 sps:$4 sm:$0xff]   ;;  %v3514_v23 = vld [vmem:[%s4166_s12 + $0x48] ss:$12 sps:$4 sm:$0xff]   ;;  %v3516_v25 = vld [vmem:[%s4166_s12 + $0x64] ss:$12 sps:$4 sm:$0xff]   ;;  %734 = vmatprep.mubr.bf16.mxu0 %v3903_v32 }
  0xa3   : > { %508 = vadd.xlane.f32.xlu0 %v503_v3  ;;  %v3518_v26 = vld [vmem:[%s4166_s12 + $0x60] ss:$12 sps:$4 sm:$0xff]   ;;  %v3519_v27 = vld [vmem:[%s4166_s12 + $0x68] ss:$12 sps:$4 sm:$0xff]   ;;  %v3522_v29 = vld [vmem:[%s4166_s12 + $0x78] ss:$12 sps:$4 sm:$0xff]  }
  0xa4   : > { %3289 = vmatpush3.bf16.msra.mxu1 %v3507_v18  ;;  %v3520_v28 = vld [vmem:[%s4166_s12 + $0x7c] ss:$12 sps:$4 sm:$0xff]   ;;  %v3523_v30 = vld [vmem:[%s4166_s12 + $0x80] ss:$12 sps:$4 sm:$0xff]   ;;  %vm3904_vm0 = vmmov 0   ;;  %v4252_v45 = vshrl.u32 %v529_v42, 7 }
  0xa5   : > { %705 = vmatpush1.bf16.msra.mxu0 %v3506_v17  ;;  %3290 = vmatprep.subr.bf16.mxu1 %v3902_v6  ;;  %v3524_v31 = vld [vmem:[%s4166_s12 + $0x94] ss:$12 sps:$4 sm:$0xff]   ;;  %v3526_v33 = vld [vmem:[%s4166_s12 + $0x90] ss:$12 sps:$4 sm:$0xff]   ;;  %v3527_v34 = vld [vmem:[%s4166_s12 + $0x98] ss:$12 sps:$4 sm:$0xff]  }
  0xa6   : > { %706 = vmatprep.subr.bf16.mxu0 %v3508_v19  ;;  %3302 = vmatprep.mubr.msk.bf16.mxu1 %vm3904_vm0, %v3902_v6  ;;  %v3528_v35 = vld [vmem:[%s4166_s12 + $0xac] ss:$12 sps:$4 sm:$0xff]   ;;  %v3530_v36 = vld [vmem:[%s4166_s12 + $0xa8] ss:$12 sps:$4 sm:$0xff]   ;;  %v3531_v37 = vld [vmem:[%s4166_s12 + $0xb0] ss:$12 sps:$4 sm:$0xff]  }
  0xa7   : > { %v531_v46 = vsub.s32 0, %v4252_v45  ;;  %v4256_v47 = vld [vmem:[%s4192_s28] sm:$0xff]  ;;  %v537_v51 = vsub.s32 1, %v4252_v45  ;;  %v795_v60 = vsub.s32 3, %v4252_v45  ;;  %v802_v61 = vsub.s32 4, %v4252_v45  ;;  %s3905_s12 = smov 96  }
  0xa8   : > { %3291 = vmatpush3.bf16.msra.mxu1 %v3511_v21  ;;  %v788_v0 = vsub.s32 2, %v4252_v45  ;;  %vm827_vm1 = vcmask 261120   ;;  %vm954_vm2 = vcmask 1043456   ;;  %vm926_vm4 = vcmask 64512   ;;  %s3906_s27 = smov 64   ;;  %s3907_s26 = smov 32  }
  0xa9   : > { %707 = vmatpush1.bf16.msra.mxu0 %v3510_v20  ;;  %3292 = vmatprep.subr.bf16.mxu1 %v3902_v6  ;;  %v532_v50 = vrot.slane %v4256_v47, %v531_v46  ;;  %v538_v55 = vrot.slane %v4256_v47, %v537_v51  ;;  %v796_v62 = vrot.slane %v4256_v47, %v795_v60  ;;  %vm1275_vm5 = vcmask 523520   ;;  %p3175_p5 = scmp.ne.s32.totalorder %s3980_s13, 1 }
  0xaa   : > { %708 = vmatprep.subr.bf16.mxu0 %v3512_v22  ;;  %vm1506_vm6 = vcmask 785920   ;;  %vm1737_vm7 = vcmask 1048320  }
  0xac   : > { %3293 = vmatpush3.bf16.msra.mxu1 %v3515_v24 }
  0xad   : > { %709 = vmatpush1.bf16.msra.mxu0 %v3514_v23  ;;  %3294 = vmatprep.subr.bf16.mxu1 %v3902_v6 }
  0xae   : > { %710 = vmatprep.subr.bf16.mxu0 %v3516_v25  ;;  %v810_v25 = vand.u32 127, %v529_v42 }
  0xb0   : > { %3295 = vmatpush3.bf16.msra.mxu1 %v3519_v27  ;;  %vm4312_vm3 = vcmp.le.s32.totalorder %v810_v25, %v4252_v45 }
  0xb1   : > { %711 = vmatpush1.bf16.msra.mxu0 %v3518_v26  ;;  %3296 = vmatprep.subr.bf16.mxu1 %v3902_v6 }
  0xb2   : > { %712 = vmatprep.subr.bf16.mxu0 %v3520_v28 }
  0xb4   : > { %3297 = vmatpush3.bf16.msra.mxu1 %v3523_v30 }
  0xb5   : > { %713 = vmatpush1.bf16.msra.mxu0 %v3522_v29  ;;  %3298 = vmatprep.subr.bf16.mxu1 %v3902_v6 }
  0xb6   : > { %714 = vmatprep.subr.bf16.mxu0 %v3524_v31 }
  0xb8   : > { %3299 = vmatpush3.bf16.msra.mxu1 %v3527_v34 }
  0xb9   : > { %715 = vmatpush1.bf16.msra.mxu0 %v3526_v33  ;;  %3300 = vmatprep.subr.bf16.mxu1 %v3902_v6 }
  0xba   : > { %716 = vmatprep.subr.bf16.mxu0 %v3528_v35 }
  0xbc   : > { %3301 = vmatpush3.bf16.msra.mxu1 %v3531_v37 }
  0xbd   : > { %717 = vmatpush1.bf16.msra.mxu0 %v3530_v36  ;;  %3306 = vmatprep.subr.bf16.mxu1 %v3902_v6 }
  0xbe   : > { %3330 = vmatprep.subr.bf16.mxu0 %v3902_v6 }
 0x12c   : > { %v507_v9 = vpop.xlane.xlu0 %506 }
 0x12d   : > { %v511_v10 = vmul.f32 0.0078125, %v507_v9 }
 0x12f   : > { %v4212_v11 = vsub.f32 %v502_v2, %v511_v10  ;;  %v803_v2 = vrot.slane %v4256_v47, %v802_v61 }
 0x130   : > { %v509_v12 = vpop.xlane.xlu0 %508 }
 0x131   : > { %v512_v13 = vmul.f32 0.0078125, %v509_v12  ;;  %v515_v14 = vmul.f32 %v4212_v11, %v4212_v11  ;;  %v789_v12 = vrot.slane %v4256_v47, %v788_v0 }
 0x133   : > { %v4216_v15 = vsub.f32 %v503_v3, %v512_v13  ;;  %517 = vadd.xlane.f32.xlu1 %v515_v14 }
 0x135   : > { %v516_v16 = vmul.f32 %v4216_v15, %v4216_v15 }
 0x137   : > { %519 = vadd.xlane.f32.xlu1 %v516_v16 }
 0x1c0   : > { %v518_v38 = vpop.xlane.xlu1 %517 }
 0x1c1   : > { %v521_v39 = vmul.f32 0.0078125, %v518_v38 }
 0x1c3   : > { %v523_v40 = vadd.f32 1e-05, %v521_v39 }
 0x1c4   : > { %v520_v41 = vpop.xlane.xlu1 %519 }
 0x1c5   : > { %3620 = vrsqrt.f32 %v523_v40  ;;  %v522_v43 = vmul.f32 0.0078125, %v520_v41 }
 0x1c7   : > { %v524_v44 = vadd.f32 1e-05, %v522_v43 }
 0x1c9   : > { %3622 = vrsqrt.f32 %v524_v44 }
 0x1cf   : > { %v3621_v48 = vpop.eup %3620 }
 0x1d0   : > { %v527_v49 = vmul.f32 %v3621_v48, %v4212_v11 }
 0x1d2   : > { %v533_v54 = vmul.f32 %v532_v50, %v527_v49 }
 0x1d3   : > { %v3623_v52 = vpop.eup %3622 }
 0x1d4   : > { %v528_v53 = vmul.f32 %v3623_v52, %v4216_v15  ;;  %v539_v57 = vadd.f32 %v538_v55, %v533_v54 }
 0x1d6   : > { %v534_v56 = vmul.f32 %v532_v50, %v528_v53 }
 0x1d8   : > { %v540_v58 = vadd.f32 %v538_v55, %v534_v56 }
 0x1da   : > { %v541_v59 = vpack.c.bf16 %v540_v58, %v539_v57 }
 0x1dc   : > { %735 = vmatmul.mubr.bf16.vlgmr.msra.gmra.mrb[0].mxu0 %v541_v59  ;;  %3303 = vmatmul.mubr.bf16.vlgmr.msra.gmra.mrb[0].mxu1 %v541_v59 }
 0x1dd   : > { %3308 = vmatprep.mubr.msk.bf16.mxu1 %vm3904_vm0, %v3902_v6  ;;  %3332 = vmatprep.mubr.msk.bf16.mxu0 %vm3904_vm0, %v3902_v6 }
 0x2af   : > { %v736_v63 = vpop.f32.mrb[0].mxu0  ;;  %v779_v1 = vpop.f32.mrb[0].mxu1 }
 0x2b0   : > { %v738_v3 = vpop.f32.mrb[1].mxu0  ;;  %v3304_v4 = vpop.f32.mrb[1].mxu1  ;;  %v790_v16 = vadd.f32 %v789_v12, %v736_v63  ;;  %v804_v19 = vadd.f32 %v803_v2, %v779_v1 }
 0x2b1   : > { %v797_v5 = vadd.f32 %v796_v62, %v738_v3  ;;  %v740_v7 = vpop.f32.mrb[2].mxu0  ;;  %v782_v8 = vpop.f32.mrb[2].mxu1 }
 0x2b2   : > { %v4278_v9 = vadd.f32 %v803_v2, %v782_v8  ;;  %v742_v10 = vpop.f32.mrb[3].mxu0  ;;  %v3305_v11 = vpop.f32.mrb[3].mxu1  ;;  %v4290_v18 = vpack.c.bf16 %v790_v16, %v790_v16  ;;  %v791_v21 = vadd.f32 %v789_v12, %v740_v7  ;;  %v4299_v22 = vpack.c.bf16 %v804_v19, %v804_v19 }
 0x2b3   : > { %v4283_v13 = vpack.c.bf16 %v797_v5, %v797_v5  ;;  %v798_v14 = vadd.f32 %v796_v62, %v742_v10 }
 0x2b4   : > { %v4301_v23 = vpack.c.bf16 %v791_v21, %v791_v21  ;;  %v956_v24 = vsel %vm954_vm2, %v4299_v22, 0  ;;  %v4336_v63 = vpack.c.bf16 %v4278_v9, %v4278_v9 }
 0x2b5   : > { %v832_v15 = vsel %vm827_vm1, %v4283_v13, 0  ;;  %v4288_v17 = vpack.c.bf16 %v798_v14, %v798_v14 }
 0x2b6   : > { %3307 = vmatpush3.bf16.xpose.msra.mxu1 %v832_v15  ;;  %v1002_v4 = vsel %vm954_vm2, %v4336_v63, 0 }
 0x2b7   : > { %3312 = vmatprep.subr.bf16.mxu1 %v3902_v6  ;;  %v878_v20 = vsel %vm827_vm1, %v4288_v17, 0 }
 0x2bd   : > { %3309 = vmatmul.mubr.msk.bf16.vlgmr.msra.gmra.mrb[4].mxu1 %vm827_vm1, %v4290_v18 }
 0x2be   : > { %3313 = vmatpush3.bf16.xpose.msra.mxu1 %v878_v20  ;;  %3314 = vmatprep.mubr.msk.bf16.mxu1 %vm3904_vm0, %v3902_v6 }
 0x2bf   : > { %3318 = vmatprep.subr.bf16.mxu1 %v3902_v6 }
 0x2c5   : > { %3315 = vmatmul.mubr.msk.bf16.vlgmr.msra.gmra.mrb[8].mxu1 %vm827_vm1, %v4301_v23 }
 0x2c6   : > { %3319 = vmatpush3.bf16.msra.mxu1 %v956_v24  ;;  %3320 = vmatprep.mubr.msk.bf16.mxu1 %vm3904_vm0, %v3902_v6 }
 0x2c7   : > { %3324 = vmatprep.subr.bf16.mxu1 %v3902_v6 }
 0x390   : > { %v868_v26 = vpop.f32.mrb[4].mxu1 }
 0x391   : > { %v920_v28 = vmul.f32 0.17677669, %v868_v26  ;;  %v3310_v29 = vpop.f32.mrb[5].mxu1 }
 0x392   : > { %v871_v30 = vpop.f32.mrb[6].mxu1 }
 0x393   : > { %v3311_v31 = vpop.f32.mrb[7].mxu1  ;;  %v924_v33 = vsel %vm4312_vm3, %v920_v28, -1e+30 }
 0x394   : > { %v927_v34 = vsel %vm926_vm4, %v924_v33, -inf }
 0x395   : > { %928 = vmax.xlane.f32.xlu0 %v927_v34 }
 0x398   : > { %v914_v35 = vpop.f32.mrb[8].mxu1 }
 0x399   : > { %v921_v36 = vmul.f32 0.17677669, %v914_v35  ;;  %v3316_v37 = vpop.f32.mrb[9].mxu1 }
 0x39a   : > { %v917_v38 = vpop.f32.mrb[10].mxu1 }
 0x39b   : > { %v3317_v39 = vpop.f32.mrb[11].mxu1  ;;  %v925_v40 = vsel %vm4312_vm3, %v921_v36, -1e+30 }
 0x39c   : > { %v930_v41 = vsel %vm926_vm4, %v925_v40, -inf }
 0x39d   : > { %931 = vmax.xlane.f32.xlu1 %v930_v41 }
 0x3ae   : > { %1098 = vrot.lane.b32.xlu1 %v4288_v17, %s3905_s12 }
 0x422   : > { %v929_v42 = vpop.xlane.xlu0 %928 }
 0x423   : > { %v933_v43 = vsub.f32 %v924_v33, %v929_v42 }
 0x425   : > { %v935_v44 = vmul.f32 1.442695, %v933_v43 }
 0x427   : > { %3624 = vpow2.f32 %v935_v44 }
 0x42a   : > { %v932_v48 = vpop.xlane.xlu1 %931 }
 0x42b   : > { %v934_v49 = vsub.f32 %v925_v40, %v932_v48 }
 0x42d   : > { %v937_v50 = vmul.f32 1.442695, %v934_v49 }
 0x42e   : > { %v1099_v57 = vpop.permute.xlu1 %1098 }
 0x42f   : > { %3626 = vpow2.f32 %v937_v50  ;;  %v1104_v9 = vsel %vm827_vm1, %v1099_v57, 0 }
 0x431   : > { %v3625_v52 = vpop.eup %3624 }
 0x432   : > { %v939_v53 = vsel %vm926_vm4, %v3625_v52, 0.0 }
 0x433   : > { %940 = vadd.xlane.f32.xlu0 %v939_v53 }
 0x439   : > { %v3627_v54 = vpop.eup %3626 }
 0x43a   : > { %v942_v55 = vsel %vm926_vm4, %v3627_v54, 0.0 }
 0x43b   : > { %943 = vadd.xlane.f32.xlu1 %v942_v55 }
 0x449   : > { %1048 = vrot.lane.b32.xlu0 %v4283_v13, %s3905_s12 }
 0x44c   : > { %1046 = vrot.lane.b32.xlu1 %v4290_v18, %s3905_s12 }
 0x450   : > { %1096 = vrot.lane.b32.xlu1 %v4301_v23, %s3905_s12 }
 0x4c0   : > { %v941_v56 = vpop.xlane.xlu0 %940 }
 0x4c1   : > { %3628 = vrcp.f32 %v941_v56 }
 0x4c4   : > { %v1049_v58 = vpop.permute.xlu0 %1048 }
 0x4c5   : > { %v1054_v59 = vsel %vm827_vm1, %v1049_v58, 0 }
 0x4c6   : > { %3331 = vmatpush3.bf16.xpose.msra.mxu0 %v1054_v59 }
 0x4c7   : > { %3342 = vmatprep.subr.bf16.mxu0 %v3902_v6 }
 0x4c8   : > { %v944_v61 = vpop.xlane.xlu1 %943 }
 0x4c9   : > { %3630 = vrcp.f32 %v944_v61 }
 0x4cb   : > { %v3629_v62 = vpop.eup %3628 }
 0x4cc   : > { %v946_v1 = vmul.f32 %v3629_v62, %v3625_v52  ;;  %v1047_v2 = vpop.permute.xlu1 %1046 }
 0x4cd   : > { %3333 = vmatmul.mubr.msk.bf16.vlgmr.msra.gmra.mrb[4].mxu0 %vm827_vm1, %v1047_v2 }
 0x4ce   : > { %v949_v3 = vpack.c.bf16 %v946_v1, %v946_v1  ;;  %3344 = vmatprep.mubr.msk.bf16.mxu0 %vm3904_vm0, %v3902_v6 }
 0x4d0   : > { %3321 = vmatmul.mubr.msk.bf16.vlgmr.msra.gmra.mrb[12].mxu1 %vm926_vm4, %v949_v3  ;;  %v1097_v10 = vpop.permute.xlu1 %1096 }
 0x4d1   : > { %3325 = vmatpush3.bf16.msra.mxu1 %v1002_v4  ;;  %3326 = vmatprep.mubr.msk.bf16.mxu1 %vm3904_vm0, %v3902_v6 }
 0x4d2   : > { %3336 = vmatprep.subr.bf16.mxu1 %v3902_v6 }
 0x4d3   : > { %v3631_v5 = vpop.eup %3630 }
 0x4d4   : > { %v948_v7 = vmul.f32 %v3631_v5, %v3627_v54 }
 0x4d6   : > { %v950_v8 = vpack.c.bf16 %v948_v7, %v948_v7 }
 0x4d8   : > { %3327 = vmatmul.mubr.msk.bf16.vlgmr.msra.gmra.mrb[16].mxu1 %vm926_vm4, %v950_v8 }
 0x4d9   : > { %3338 = vmatprep.mubr.msk.bf16.mxu1 %vm3904_vm0, %v3902_v6 }
 0x4da   : > { %3337 = vmatpush3.bf16.xpose.msra.mxu1 %v1104_v9 }
 0x4db   : > { %3348 = vmatprep.subr.bf16.mxu1 %v3902_v6 }
 0x4e1   : > { %3339 = vmatmul.mubr.msk.bf16.vlgmr.msra.gmra.mrb[20].mxu1 %vm827_vm1, %v1097_v10 }
 0x4e2   : > { %3350 = vmatprep.mubr.msk.bf16.mxu1 %vm3904_vm0, %v3902_v6 }
 0x5a0   : > { %v1090_v11 = vpop.f32.mrb[4].mxu0 }
 0x5a1   : > { %v1146_v12 = vmul.f32 0.17677669, %v1090_v11  ;;  %v3334_v14 = vpop.f32.mrb[5].mxu0 }
 0x5a2   : > { %v1093_v15 = vpop.f32.mrb[6].mxu0 }
 0x5a3   : > { %v992_v16 = vpop.f32.mrb[12].mxu1  ;;  %v3335_v19 = vpop.f32.mrb[7].mxu0  ;;  %v1148_v20 = vsel %vm4312_vm3, %v1146_v12, -1e+30 }
 0x5a4   : > { %v3322_v21 = vpop.f32.mrb[13].mxu1  ;;  %v1150_v24 = vsel %vm926_vm4, %v1148_v20, -inf }
 0x5a5   : > { %1151 = vmax.xlane.f32.xlu0 %v1150_v24  ;;  %v995_v25 = vpop.f32.mrb[14].mxu1 }
 0x5a6   : > { %v3323_v26 = vpop.f32.mrb[15].mxu1 }
 0x5ab   : > { %v1038_v28 = vpop.f32.mrb[16].mxu1 }
 0x5ac   : > { %v1044_v29 = vpack.c.bf16 %v1038_v28, %v992_v16  ;;  %v3328_v30 = vpop.f32.mrb[17].mxu1 }
 0x5ad   : > { %v1041_v31 = vpop.f32.mrb[18].mxu1 }
 0x5ae   : > { %1045 = vst.msk [vmem:[#allocation2] sm:$0xff] %vm827_vm1, %v1044_v29  ;;  %v3329_v33 = vpop.f32.mrb[19].mxu1 }
 0x5b4   : > { %v1140_v34 = vpop.f32.mrb[20].mxu1 }
 0x5b5   : > { %v1147_v35 = vmul.f32 0.17677669, %v1140_v34  ;;  %v3340_v36 = vpop.f32.mrb[21].mxu1 }
 0x5b6   : > { %v1143_v37 = vpop.f32.mrb[22].mxu1 }
 0x5b7   : > { %v3341_v38 = vpop.f32.mrb[23].mxu1  ;;  %v1149_v39 = vsel %vm4312_vm3, %v1147_v35, -1e+30 }
 0x5b8   : > { %v1153_v40 = vsel %vm926_vm4, %v1149_v39, -inf }
 0x5b9   : > { %1154 = vmax.xlane.f32.xlu1 %v1153_v40 }
 0x5ca   : > { %1222 = vrot.lane.b32.xlu1 %v4336_v63, %s3905_s12 }
 0x5ce   : > { %1279 = vrot.lane.b32.xlu1 %v4283_v13, %s3906_s27 }
 0x5d2   : > { %1329 = vrot.lane.b32.xlu1 %v4288_v17, %s3906_s27 }
 0x5d6   : > { %1327 = vrot.lane.b32.xlu1 %v4301_v23, %s3906_s27 }
 0x632   : > { %v1152_v41 = vpop.xlane.xlu0 %1151 }
 0x633   : > { %v1156_v42 = vsub.f32 %v1148_v20, %v1152_v41 }
 0x635   : > { %v1158_v43 = vmul.f32 1.442695, %v1156_v42 }
 0x637   : > { %3632 = vpow2.f32 %v1158_v43 }
 0x641   : > { %v3633_v44 = vpop.eup %3632 }
 0x642   : > { %v1162_v48 = vsel %vm926_vm4, %v3633_v44, 0.0 }
 0x643   : > { %1163 = vadd.xlane.f32.xlu0 %v1162_v48 }
 0x646   : > { %v1155_v49 = vpop.xlane.xlu1 %1154 }
 0x647   : > { %v1157_v50 = vsub.f32 %v1149_v39, %v1155_v49 }
 0x649   : > { %v1160_v52 = vmul.f32 1.442695, %v1157_v50 }
 0x64a   : > { %v1223_v53 = vpop.permute.xlu1 %1222 }
 0x64b   : > { %3634 = vpow2.f32 %v1160_v52  ;;  %v1228_v54 = vsel %vm954_vm2, %v1223_v53, 0 }
 0x64c   : > { %3349 = vmatpush3.bf16.msra.mxu1 %v1228_v54 }
 0x64d   : > { %3360 = vmatprep.subr.bf16.mxu1 %v3902_v6 }
 0x64e   : > { %v1280_v2 = vpop.permute.xlu1 %1279 }
 0x64f   : > { %v1285_v8 = vsel %vm827_vm1, %v1280_v2, 0 }
 0x652   : > { %v1330_v7 = vpop.permute.xlu1 %1329 }
 0x653   : > { %v1335_v10 = vsel %vm827_vm1, %v1330_v7, 0 }
 0x655   : > { %v3635_v55 = vpop.eup %3634 }
 0x656   : > { %v1165_v56 = vsel %vm926_vm4, %v3635_v55, 0.0  ;;  %v1328_v12 = vpop.permute.xlu1 %1327 }
 0x657   : > { %1166 = vadd.xlane.f32.xlu0 %v1165_v56 }
 0x66d   : > { %1174 = vrot.lane.b32.xlu0 %v4299_v22, %s3905_s12 }
 0x671   : > { %1277 = vrot.lane.b32.xlu0 %v4290_v18, %s3906_s27 }
 0x6d0   : > { %v1164_v57 = vpop.xlane.xlu0 %1163 }
 0x6d1   : > { %3636 = vrcp.f32 %v1164_v57 }
 0x6db   : > { %v3637_v58 = vpop.eup %3636 }
 0x6dc   : > { %v1169_v61 = vmul.f32 %v3637_v58, %v3633_v44 }
 0x6de   : > { %v1172_v3 = vpack.c.bf16 %v1169_v61, %v1169_v61 }
 0x6e4   : > { %v1167_v59 = vpop.xlane.xlu0 %1166 }
 0x6e5   : > { %3638 = vrcp.f32 %v1167_v59 }
 0x6e8   : > { %v1175_v62 = vpop.permute.xlu0 %1174 }
 0x6e9   : > { %v1180_v1 = vsel %vm954_vm2, %v1175_v62, 0 }
 0x6ea   : > { %3343 = vmatpush3.bf16.msra.mxu0 %v1180_v1 }
 0x6eb   : > { %3354 = vmatprep.subr.bf16.mxu0 %v3902_v6 }
 0x6ec   : > { %v1278_v11 = vpop.permute.xlu0 %1277 }
 0x6ed   : > { %3345 = vmatmul.mubr.msk.bf16.vlgmr.msra.gmra.mrb[8].mxu0 %vm926_vm4, %v1172_v3 }
 0x6ee   : > { %3356 = vmatprep.mubr.msk.bf16.mxu0 %vm3904_vm0, %v3902_v6 }
 0x6ef   : > { %v3639_v4 = vpop.eup %3638 }
 0x6f0   : > { %v1171_v5 = vmul.f32 %v3639_v4, %v3635_v55 }
 0x6f2   : > { %v1173_v9 = vpack.c.bf16 %v1171_v5, %v1171_v5 }
 0x6f3   : > { %3355 = vmatpush3.bf16.xpose.msra.mxu0 %v1285_v8 }
 0x6f4   : > { %3351 = vmatmul.mubr.msk.bf16.vlgmr.msra.gmra.mrb[24].mxu1 %vm926_vm4, %v1173_v9  ;;  %3366 = vmatprep.subr.bf16.mxu0 %v3902_v6 }
 0x6f5   : > { %3361 = vmatpush3.bf16.xpose.msra.mxu1 %v1335_v10  ;;  %3362 = vmatprep.mubr.msk.bf16.mxu1 %vm3904_vm0, %v3902_v6 }
 0x6f6   : > { %3372 = vmatprep.subr.bf16.mxu1 %v3902_v6 }
 0x6fa   : > { %3357 = vmatmul.mubr.msk.bf16.vlgmr.msra.gmra.mrb[12].mxu0 %vm827_vm1, %v1278_v11 }
 0x6fb   : > { %3368 = vmatprep.mubr.msk.bf16.mxu0 %vm3904_vm0, %v3902_v6 }
 0x6fc   : > { %3363 = vmatmul.mubr.msk.bf16.vlgmr.msra.gmra.mrb[28].mxu1 %vm827_vm1, %v1328_v12 }
 0x6fd   : > { %3374 = vmatprep.mubr.msk.bf16.mxu1 %vm3904_vm0, %v3902_v6 }
 0x7c0   : > { %v4396_v14 = vpop.f32.mrb[8].mxu0 }
 0x7c1   : > { %v3346_v15 = vpop.f32.mrb[9].mxu0 }
 0x7c2   : > { %v1219_v16 = vpop.f32.mrb[10].mxu0 }
 0x7c3   : > { %v3347_v19 = vpop.f32.mrb[11].mxu0 }
 0x7c7   : > { %v4398_v20 = vpop.f32.mrb[24].mxu1 }
 0x7c8   : > { %v1270_v21 = vpack.c.bf16 %v4398_v20, %v4396_v14  ;;  %v3352_v24 = vpop.f32.mrb[25].mxu1 }
 0x7c9   : > { %v1267_v25 = vpop.f32.mrb[26].mxu1 }
 0x7ca   : > { %v3353_v26 = vpop.f32.mrb[27].mxu1 }
 0x7cd   : > { %v1321_v28 = vpop.f32.mrb[12].mxu0 }
 0x7ce   : > { %v1377_v29 = vmul.f32 0.17677669, %v1321_v28  ;;  %v3358_v30 = vpop.f32.mrb[13].mxu0 }
 0x7cf   : > { %v1324_v31 = vpop.f32.mrb[14].mxu0  ;;  %v1371_v33 = vpop.f32.mrb[28].mxu1 }
 0x7d0   : > { %v1378_v34 = vmul.f32 0.17677669, %v1371_v33  ;;  %v3359_v35 = vpop.f32.mrb[15].mxu0  ;;  %v3364_v36 = vpop.f32.mrb[29].mxu1  ;;  %v1379_v37 = vsel %vm4312_vm3, %v1377_v29, -1e+30 }
 0x7d1   : > { %v1374_v38 = vpop.f32.mrb[30].mxu1  ;;  %v1381_v39 = vsel %vm926_vm4, %v1379_v37, -inf }
 0x7d2   : > { %1382 = vmax.xlane.f32.xlu0 %v1381_v39  ;;  %v3365_v40 = vpop.f32.mrb[31].mxu1  ;;  %v1380_v41 = vsel %vm4312_vm3, %v1378_v34, -1e+30 }
 0x7d3   : > { %v1384_v42 = vsel %vm926_vm4, %v1380_v41, -inf }
 0x7d4   : > { %1385 = vmax.xlane.f32.xlu1 %v1384_v42 }
 0x7e5   : > { %1453 = vrot.lane.b32.xlu1 %v4336_v63, %s3906_s27 }
 0x7e9   : > { %1510 = vrot.lane.b32.xlu1 %v4283_v13, %s3907_s26 }
 0x7ed   : > { %1560 = vrot.lane.b32.xlu1 %v4288_v17, %s3907_s26 }
 0x7f1   : > { %1558 = vrot.lane.b32.xlu1 %v4301_v23, %s3907_s26 }
 0x85f   : > { %v1383_v43 = vpop.xlane.xlu0 %1382 }
 0x860   : > { %v1387_v44 = vsub.f32 %v1379_v37, %v1383_v43 }
 0x861   : > { %v1386_v48 = vpop.xlane.xlu1 %1385 }
 0x862   : > { %v1389_v49 = vmul.f32 1.442695, %v1387_v44  ;;  %v1388_v50 = vsub.f32 %v1380_v41, %v1386_v48 }
 0x864   : > { %3640 = vpow2.f32 %v1389_v49  ;;  %v1391_v52 = vmul.f32 1.442695, %v1388_v50 }
 0x865   : > { %v1454_v53 = vpop.permute.xlu1 %1453 }
 0x866   : > { %3642 = vpow2.f32 %v1391_v52  ;;  %v1459_v54 = vsel %vm954_vm2, %v1454_v53, 0 }
 0x867   : > { %3373 = vmatpush3.bf16.msra.mxu1 %v1459_v54 }
 0x868   : > { %3384 = vmatprep.subr.bf16.mxu1 %v3902_v6 }
 0x869   : > { %v1511_v62 = vpop.permute.xlu1 %1510 }
 0x86d   : > { %v1561_v5 = vpop.permute.xlu1 %1560 }
 0x86e   : > { %v3641_v13 = vpop.eup %3640  ;;  %v1566_v8 = vsel %vm827_vm1, %v1561_v5, 0  ;;  %v3535_v5 = vld [vmem:[%s4173_s30 + $0x18] sm:$0xff]  }
 0x86f   : > { %v1393_v17 = vsel %vm926_vm4, %v3641_v13, 0.0 }
 0x870   : > { %v3643_v55 = vpop.eup %3642  ;;  %1394 = vadd.xlane.f32.xlu0 %v1393_v17 }
 0x871   : > { %v1396_v23 = vsel %vm926_vm4, %v3643_v55, 0.0  ;;  %v1559_v10 = vpop.permute.xlu1 %1558 }
 0x874   : > { %1397 = vadd.xlane.f32.xlu0 %v1396_v23 }
 0x88a   : > { %1405 = vrot.lane.b32.xlu0 %v4299_v22, %s3906_s27 }
 0x88e   : > { %1508 = vrot.lane.b32.xlu0 %v4290_v18, %s3907_s26  ;;  %v1516_v18 = vsel %vm827_vm1, %v1511_v62, 0 }
 0x8fd   : > { %v1395_v56 = vpop.xlane.xlu0 %1394 }
 0x8fe   : > { %3644 = vrcp.f32 %v1395_v56 }
 0x901   : > { %v1398_v57 = vpop.xlane.xlu0 %1397 }
 0x902   : > { %3646 = vrcp.f32 %v1398_v57 }
 0x905   : > { %v1406_v58 = vpop.permute.xlu0 %1405 }
 0x906   : > { %v1411_v59 = vsel %vm954_vm2, %v1406_v58, 0 }
 0x907   : > { %3367 = vmatpush3.bf16.msra.mxu0 %v1411_v59 }
 0x908   : > { %v3645_v61 = vpop.eup %3644  ;;  %3378 = vmatprep.subr.bf16.mxu0 %v3902_v6 }
 0x909   : > { %v1400_v1 = vmul.f32 %v3645_v61, %v3641_v13  ;;  %v1509_v9 = vpop.permute.xlu0 %1508 }
 0x90b   : > { %v1403_v2 = vpack.c.bf16 %v1400_v1, %v1400_v1 }
 0x90c   : > { %v3647_v3 = vpop.eup %3646 }
 0x90d   : > { %v1402_v4 = vmul.f32 %v3647_v3, %v3643_v55  ;;  %3369 = vmatmul.mubr.msk.bf16.vlgmr.msra.gmra.mrb[16].mxu0 %vm926_vm4, %v1403_v2  ;;  %v3532_v2 = vld [vmem:[%s4173_s30] sm:$0xff]   ;;  %v3533_v3 = vld [vmem:[%s4173_s30 + $0x8] sm:$0xff]  }
 0x90e   : > { %3380 = vmatprep.mubr.msk.bf16.mxu0 %vm3904_vm0, %v3902_v6 }
 0x90f   : > { %v1404_v7 = vpack.c.bf16 %v1402_v4, %v1402_v4  ;;  %v3534_v4 = vld [vmem:[%s4173_s30 + $0x10] sm:$0xff]  }
 0x910   : > { %3379 = vmatpush3.bf16.xpose.msra.mxu0 %v1516_v18  ;;  %v3536_v18 = vld [vmem:[%s4173_s30 + $0x20] sm:$0xff]  }
 0x911   : > { %3375 = vmatmul.mubr.msk.bf16.vlgmr.msra.gmra.mrb[32].mxu1 %vm926_vm4, %v1404_v7  ;;  %3390 = vmatprep.subr.bf16.mxu0 %v3902_v6  ;;  %v3537_v7 = vld [vmem:[%s4173_s30 + $0x28] sm:$0xff]  }
 0x912   : > { %3385 = vmatpush3.bf16.xpose.msra.mxu1 %v1566_v8  ;;  %3386 = vmatprep.mubr.msk.bf16.mxu1 %vm3904_vm0, %v3902_v6  ;;  %v3538_v8 = vld [vmem:[%s4173_s30 + $0x30] sm:$0xff]  }
 0x913   : > { %3396 = vmatprep.subr.bf16.mxu1 %v3902_v6 }
 0x917   : > { %3381 = vmatmul.mubr.msk.bf16.vlgmr.msra.gmra.mrb[20].mxu0 %vm827_vm1, %v1509_v9  ;;  %v3539_v9 = vld [vmem:[%s4173_s30 + $0x38] sm:$0xff]  }
 0x918   : > { %3392 = vmatprep.mubr.msk.bf16.mxu0 %vm3904_vm0, %v3902_v6 }
 0x919   : > { %3387 = vmatmul.mubr.msk.bf16.vlgmr.msra.gmra.mrb[36].mxu1 %vm827_vm1, %v1559_v10 }
 0x91a   : > { %3398 = vmatprep.mubr.msk.bf16.mxu1 %vm3904_vm0, %v3902_v6 }
 0x9e0   : > { %v1447_v11 = vpop.f32.mrb[16].mxu0 }
 0x9e1   : > { %v3370_v12 = vpop.f32.mrb[17].mxu0 }
 0x9e2   : > { %v1450_v15 = vpop.f32.mrb[18].mxu0 }
 0x9e3   : > { %v3371_v16 = vpop.f32.mrb[19].mxu0 }
 0x9e4   : > { %v1495_v19 = vpop.f32.mrb[32].mxu1 }
 0x9e5   : > { %v1501_v24 = vpack.c.bf16 %v1495_v19, %v1447_v11  ;;  %v3376_v25 = vpop.f32.mrb[33].mxu1 }
 0x9e6   : > { %v1498_v26 = vpop.f32.mrb[34].mxu1 }
 0x9e7   : > { %v3377_v28 = vpop.f32.mrb[35].mxu1 }
 0x9ea   : > { %v1552_v29 = vpop.f32.mrb[20].mxu0 }
 0x9eb   : > { %v1608_v30 = vmul.f32 0.17677669, %v1552_v29  ;;  %v3382_v31 = vpop.f32.mrb[21].mxu0 }
 0x9ec   : > { %v1555_v33 = vpop.f32.mrb[22].mxu0  ;;  %v1602_v34 = vpop.f32.mrb[36].mxu1 }
 0x9ed   : > { %v1609_v35 = vmul.f32 0.17677669, %v1602_v34  ;;  %v3383_v36 = vpop.f32.mrb[23].mxu0  ;;  %v3388_v37 = vpop.f32.mrb[37].mxu1  ;;  %v1610_v38 = vsel %vm4312_vm3, %v1608_v30, -1e+30 }
 0x9ee   : > { %v1605_v39 = vpop.f32.mrb[38].mxu1  ;;  %v1612_v40 = vsel %vm926_vm4, %v1610_v38, -inf  ;;  %v3692_v36 = vld [vmem:[#allocation11] sm:$0xff] }
 0x9ef   : > { %1613 = vmax.xlane.f32.xlu0 %v1612_v40  ;;  %v3389_v41 = vpop.f32.mrb[39].mxu1  ;;  %v1611_v42 = vsel %vm4312_vm3, %v1609_v35, -1e+30 }
 0x9f0   : > { %v1615_v43 = vsel %vm926_vm4, %v1611_v42, -inf  ;;  %v3540_v41 = vld [vmem:[%s4179_s24] ss:$16 sps:$4 sm:$0xff]  }
 0x9f1   : > { %1616 = vmax.xlane.f32.xlu1 %v1615_v43  ;;  %v3543_v43 = vld [vmem:[%s4179_s24 + $0x8] ss:$16 sps:$4 sm:$0xff]  }
 0xa02   : > { %1684 = vrot.lane.b32.xlu1 %v4336_v63, %s3907_s26 }
 0xa06   : > { %1272 = vrot.lane.b32.xlu1 %v1270_v21, %s3907_s26 }
 0xa0a   : > { %1503 = vrot.lane.b32.xlu1 %v1501_v24, %s3906_s27 }
 0xa7c   : > { %v1614_v44 = vpop.xlane.xlu0 %1613 }
 0xa7d   : > { %v1618_v48 = vsub.f32 %v1610_v38, %v1614_v44  ;;  %v3545_v44 = vld [vmem:[%s4179_s24 + $0xc] ss:$16 sps:$4 sm:$0xff]  }
 0xa7e   : > { %v1617_v49 = vpop.xlane.xlu1 %1616 }
 0xa7f   : > { %v1620_v50 = vmul.f32 1.442695, %v1618_v48  ;;  %v1619_v52 = vsub.f32 %v1611_v42, %v1617_v49  ;;  %v3542_v42 = vld [vmem:[%s4179_s24 + $0x4] ss:$16 sps:$4 sm:$0xff]   ;;  %v3551_v49 = vld [vmem:[%s4179_s24 + $0x2c] ss:$16 sps:$4 sm:$0xff]  }
 0xa80   : > { %v3548_v48 = vld [vmem:[%s4179_s24 + $0x24] ss:$16 sps:$4 sm:$0xff]  }
 0xa81   : > { %3648 = vpow2.f32 %v1620_v50  ;;  %v1622_v27 = vmul.f32 1.442695, %v1619_v52  ;;  %v3546_v50 = vld [vmem:[%s4179_s24 + $0x20] ss:$16 sps:$4 sm:$0xff]   ;;  %v3549_v52 = vld [vmem:[%s4179_s24 + $0x28] ss:$16 sps:$4 sm:$0xff]  }
 0xa82   : > { %v1685_v53 = vpop.permute.xlu1 %1684 }
 0xa83   : > { %3650 = vpow2.f32 %v1622_v27  ;;  %v1690_v54 = vsel %vm954_vm2, %v1685_v53, 0 }
 0xa84   : > { %3397 = vmatpush3.bf16.msra.mxu1 %v1690_v54 }
 0xa85   : > { %2100 = vmatprep.subr.bf16.mxu1 %v3542_v42 }
 0xa86   : > { %v1273_v63 = vpop.permute.xlu1 %1272 }
 0xa87   : > { %1276 = vst.msk [vmem:[#allocation2] sm:$0xff] %vm1275_vm5, %v1273_v63 }
 0xa8a   : > { %v1504_v14 = vpop.permute.xlu1 %1503 }
 0xa8b   : > { %v3649_v20 = vpop.eup %3648  ;;  %1507 = vst.msk [vmem:[#allocation2] sm:$0xff] %vm1506_vm6, %v1504_v14 }
 0xa8c   : > { %v1624_v21 = vsel %vm926_vm4, %v3649_v20, 0.0 }
 0xa8d   : > { %v3651_v13 = vpop.eup %3650  ;;  %1625 = vadd.xlane.f32.xlu0 %v1624_v21 }
 0xa8e   : > { %v1627_v17 = vsel %vm926_vm4, %v3651_v13, 0.0 }
 0xa91   : > { %1628 = vadd.xlane.f32.xlu0 %v1627_v17  ;;  %v3554_v17 = vld [vmem:[%s4179_s24 + $0x44] ss:$16 sps:$4 sm:$0xff]  }
 0xaa7   : > { %1636 = vrot.lane.b32.xlu0 %v4299_v22, %s3907_s26 }
 0xb1a   : > { %v1626_v55 = vpop.xlane.xlu0 %1625 }
 0xb1b   : > { %3652 = vrcp.f32 %v1626_v55  ;;  %v3557_v55 = vld [vmem:[%s4179_s24 + $0x4c] ss:$16 sps:$4 sm:$0xff]  }
 0xb1e   : > { %v1629_v23 = vpop.xlane.xlu0 %1628 }
 0xb1f   : > { %3654 = vrcp.f32 %v1629_v23  ;;  %v3552_v23 = vld [vmem:[%s4179_s24 + $0x40] ss:$16 sps:$4 sm:$0xff]  }
 0xb22   : > { %v1637_v56 = vpop.permute.xlu0 %1636 }
 0xb23   : > { %v1642_v57 = vsel %vm954_vm2, %v1637_v56, 0  ;;  %v3555_v56 = vld [vmem:[%s4179_s24 + $0x48] ss:$16 sps:$4 sm:$0xff]  }
 0xb24   : > { %3391 = vmatpush3.bf16.msra.mxu0 %v1642_v57  ;;  %v3560_v57 = vld [vmem:[%s4179_s24 + $0x64] ss:$16 sps:$4 sm:$0xff]  }
 0xb25   : > { %v3653_v58 = vpop.eup %3652  ;;  %3402 = vmatprep.subr.bf16.mxu0 %v3902_v6 }
 0xb26   : > { %v1631_v59 = vmul.f32 %v3653_v58, %v3649_v20  ;;  %v3563_v58 = vld [vmem:[%s4179_s24 + $0x6c] ss:$16 sps:$4 sm:$0xff]  }
 0xb28   : > { %v1634_v61 = vpack.c.bf16 %v1631_v59, %v1631_v59  ;;  %v3558_v59 = vld [vmem:[%s4179_s24 + $0x60] ss:$16 sps:$4 sm:$0xff]  }
 0xb29   : > { %v3655_v62 = vpop.eup %3654 }
 0xb2a   : > { %v1633_v1 = vmul.f32 %v3655_v62, %v3651_v13  ;;  %3393 = vmatmul.mubr.msk.bf16.vlgmr.msra.gmra.mrb[24].mxu0 %vm926_vm4, %v1634_v61  ;;  %v3561_v61 = vld [vmem:[%s4179_s24 + $0x68] ss:$16 sps:$4 sm:$0xff]   ;;  %v3566_v62 = vld [vmem:[%s4179_s24 + $0x84] ss:$16 sps:$4 sm:$0xff]  }
 0xb2b   : > { %3418 = vmatprep.mubr.msk.bf16.mxu0 %vm3904_vm0, %v3902_v6  ;;  %3403 = vmatpush3.bf16.msra.mxu0 %v3532_v2  ;;  %v3567_v2 = vld [vmem:[%s4179_s24 + $0x88] ss:$16 sps:$4 sm:$0xff]  }
 0xb2c   : > { %v1635_v22 = vpack.c.bf16 %v1633_v1, %v1633_v1  ;;  %3404 = vmatprep.subr.bf16.mxu0 %v3902_v6  ;;  %v3569_v1 = vld [vmem:[%s4179_s24 + $0x8c] ss:$16 sps:$4 sm:$0xff]  }
 0xb2e   : > { %3399 = vmatmul.mubr.msk.bf16.vlgmr.msra.gmra.mrb[40].mxu1 %vm926_vm4, %v1635_v22  ;;  %v3564_v22 = vld [vmem:[%s4179_s24 + $0x80] ss:$16 sps:$4 sm:$0xff]  }
 0xb2f   : > { %2132 = vmatprep.mubr.bf16.mxu1 %v3903_v32  ;;  %3405 = vmatpush3.bf16.msra.mxu0 %v3533_v3  ;;  %v3572_v3 = vld [vmem:[%s4179_s24 + $0xa4] ss:$16 sps:$4 sm:$0xff]  }
 0xb30   : > { %3406 = vmatprep.subr.bf16.mxu0 %v3902_v6  ;;  %2101 = vmatpush1.bf16.msra.mxu1 %v3540_v41 }
 0xb31   : > { %2102 = vmatprep.subr.bf16.mxu1 %v3548_v48  ;;  %v3589_v48 = vld [vmem:[%s4181_s16 + $0xc0] sm:$0xff]  }
 0xb33   : > { %3407 = vmatpush3.bf16.msra.mxu0 %v3534_v4  ;;  %v3575_v4 = vld [vmem:[%s4179_s24 + $0xac] ss:$16 sps:$4 sm:$0xff]  }
 0xb34   : > { %3408 = vmatprep.subr.bf16.mxu0 %v3902_v6  ;;  %2103 = vmatpush1.bf16.msra.mxu1 %v3546_v50  ;;  %v3591_v50 = vld [vmem:[%s4181_s16 + $0x80] sm:$0xff]  }
 0xb35   : > { %2104 = vmatprep.subr.bf16.mxu1 %v3554_v17  ;;  %v3602_v17 = vld [vmem:[%s4181_s16 + $0x18] sm:$0xff]  }
 0xb37   : > { %3409 = vmatpush3.bf16.msra.mxu0 %v3535_v5  ;;  %v3570_v5 = vld [vmem:[%s4179_s24 + $0xa0] ss:$16 sps:$4 sm:$0xff]  }
 0xb38   : > { %3410 = vmatprep.subr.bf16.mxu0 %v3902_v6  ;;  %2105 = vmatpush1.bf16.msra.mxu1 %v3552_v23  ;;  %v3604_v23 = vld [vmem:[%s4181_s16 + $0x60] sm:$0xff]  }
 0xb39   : > { %2106 = vmatprep.subr.bf16.mxu1 %v3560_v57  ;;  %v3606_v57 = vld [vmem:[%s4181_s16 + $0x20] sm:$0xff]  }
 0xb3b   : > { %3411 = vmatpush3.bf16.msra.mxu0 %v3536_v18  ;;  %v3573_v18 = vld [vmem:[%s4179_s24 + $0xa8] ss:$16 sps:$4 sm:$0xff]  }
 0xb3c   : > { %3412 = vmatprep.subr.bf16.mxu0 %v3902_v6  ;;  %2107 = vmatpush1.bf16.msra.mxu1 %v3558_v59  ;;  %v3608_v59 = vld [vmem:[%s4181_s16 + $0x68] sm:$0xff]  }
 0xb3d   : > { %2108 = vmatprep.subr.bf16.mxu1 %v3566_v62  ;;  %v3610_v62 = vld [vmem:[%s4181_s16 + $0x28] sm:$0xff]  }
 0xb3f   : > { %3413 = vmatpush3.bf16.msra.mxu0 %v3537_v7  ;;  %v3578_v7 = vld [vmem:[%s4179_s24 + $0xc4] ss:$16 sps:$4 sm:$0xff]  }
 0xb40   : > { %3414 = vmatprep.subr.bf16.mxu0 %v3902_v6  ;;  %2109 = vmatpush1.bf16.msra.mxu1 %v3564_v22  ;;  %v3612_v22 = vld [vmem:[%s4181_s16 + $0x70] sm:$0xff]  }
 0xb41   : > { %2110 = vmatprep.subr.bf16.mxu1 %v3572_v3  ;;  %v3614_v3 = vld [vmem:[%s4181_s16 + $0x30] sm:$0xff]  }
 0xb43   : > { %3415 = vmatpush3.bf16.msra.mxu0 %v3538_v8  ;;  %v3581_v8 = vld [vmem:[%s4179_s24 + $0xcc] ss:$16 sps:$4 sm:$0xff]  }
 0xb44   : > { %3416 = vmatprep.subr.bf16.mxu0 %v3902_v6  ;;  %v1758_v6 = vsub.s32 5, %v4252_v45  ;;  %2111 = vmatpush1.bf16.msra.mxu1 %v3570_v5  ;;  %v3616_v5 = vld [vmem:[%s4181_s16 + $0x78] sm:$0xff]  }
 0xb45   : > { %2112 = vmatprep.subr.bf16.mxu1 %v3578_v7  ;;  %v3618_v7 = vld [vmem:[%s4181_s16 + $0x38] sm:$0xff]  }
 0xb46   : > { %v1759_v30 = vrot.slane %v4256_v47, %v1758_v6  ;;  %v1875_v6 = vsub.s32 6, %v4252_v45 }
 0xb47   : > { %3417 = vmatpush3.bf16.msra.mxu0 %v3539_v9  ;;  %v3576_v9 = vld [vmem:[%s4179_s24 + $0xc0] ss:$16 sps:$4 sm:$0xff]  }
 0xb48   : > { %2143 = vmatprep.subr.bf16.mxu0 %v3545_v44  ;;  %2113 = vmatpush1.bf16.msra.mxu1 %v3576_v9  ;;  %v3588_v44 = vld [vmem:[%s4181_s16 + $0x40] sm:$0xff]   ;;  %v1918_v9 = vld [vmem:[%s4197_s17] sm:$0xf] }
 0xbfd   : > { %v1678_v10 = vpop.f32.mrb[24].mxu0 }
 0xbfe   : > { %v3394_v11 = vpop.f32.mrb[25].mxu0 }
 0xbff   : > { %v1681_v12 = vpop.f32.mrb[26].mxu0  ;;  %v3584_v11 = vld [vmem:[%s4179_s24 + $0xe4] ss:$16 sps:$4 sm:$0xff]  }
 0xc00   : > { %v3395_v15 = vpop.f32.mrb[27].mxu0  ;;  %v3587_v12 = vld [vmem:[%s4179_s24 + $0xec] ss:$16 sps:$4 sm:$0xff]   ;;  %2114 = vmatprep.subr.bf16.mxu1 %v3584_v11  ;;  %v1931_v11 = vrot.slane %v1918_v9, %v788_v0 }
 0xc01   : > { %v1726_v16 = vpop.f32.mrb[40].mxu1  ;;  %v3582_v15 = vld [vmem:[%s4179_s24 + $0xe0] ss:$16 sps:$4 sm:$0xff]  }
 0xc02   : > { %v1732_v19 = vpack.c.bf16 %v1726_v16, %v1678_v10  ;;  %v3400_v24 = vpop.f32.mrb[41].mxu1  ;;  %v3579_v10 = vld [vmem:[%s4179_s24 + $0xc8] ss:$16 sps:$4 sm:$0xff]   ;;  %2115 = vmatpush1.bf16.msra.mxu1 %v3582_v15  ;;  %v1935_v15 = vrot.slane %v1918_v9, %v795_v60 }
 0xc03   : > { %v1729_v25 = vpop.f32.mrb[42].mxu1  ;;  %v3585_v16 = vld [vmem:[%s4179_s24 + $0xe8] ss:$16 sps:$4 sm:$0xff]   ;;  %3242 = vmatprep.subr.bf16.mxu1 %v3588_v44 }
 0xc04   : > { %1734 = vrot.lane.b32.xlu0 %v1732_v19, %s3905_s12  ;;  %v3401_v26 = vpop.f32.mrb[43].mxu1 }
 0xc76   : > { %v1735_v28 = vpop.permute.xlu0 %1734 }
 0xc77   : > { %1738 = vst.msk [vmem:[#allocation2] sm:$0xff] %vm1737_vm7, %v1735_v28 }
 0xc7e   : > { %v1739_v29 = vld [vmem:[#allocation2] sm:$0xff] }
 0xc7f   : > { %3419 = vmatmul.mubr.bf16.vlgmr.msra.gmra.mrb[28].mxu0 %v1739_v29 }
 0xc80   : > { %2175 = vmatprep.mubr.bf16.mxu0 %v3903_v32  ;;  %v3693_v32 = vld [vmem:[#allocation11 + $0x8] sm:$0xff]  ;;  %2144 = vmatpush1.bf16.msra.mxu0 %v3543_v43 }
 0xc81   : > { %2145 = vmatprep.subr.bf16.mxu0 %v3551_v49  ;;  %v3590_v49 = vld [vmem:[%s4181_s16] sm:$0xff]  }
 0xc84   : > { %2146 = vmatpush1.bf16.msra.mxu0 %v3549_v52  ;;  %v3593_v52 = vld [vmem:[%s4181_s16 + $0xc8] sm:$0xff]  }
 0xc85   : > { %2147 = vmatprep.subr.bf16.mxu0 %v3557_v55  ;;  %v3603_v55 = vld [vmem:[%s4181_s16 + $0x98] sm:$0xff]  }
 0xc88   : > { %2148 = vmatpush1.bf16.msra.mxu0 %v3555_v56  ;;  %v3605_v56 = vld [vmem:[%s4181_s16 + $0xe0] sm:$0xff]  }
 0xc89   : > { %2149 = vmatprep.subr.bf16.mxu0 %v3563_v58  ;;  %v3607_v58 = vld [vmem:[%s4181_s16 + $0xa0] sm:$0xff]  }
 0xc8c   : > { %2150 = vmatpush1.bf16.msra.mxu0 %v3561_v61  ;;  %v3609_v61 = vld [vmem:[%s4181_s16 + $0xe8] sm:$0xff]  }
 0xc8d   : > { %2151 = vmatprep.subr.bf16.mxu0 %v3569_v1  ;;  %v3611_v1 = vld [vmem:[%s4181_s16 + $0xa8] sm:$0xff]  }
 0xc90   : > { %2152 = vmatpush1.bf16.msra.mxu0 %v3567_v2  ;;  %v3613_v2 = vld [vmem:[%s4181_s16 + $0xf0] sm:$0xff]  }
 0xc91   : > { %2153 = vmatprep.subr.bf16.mxu0 %v3575_v4  ;;  %v3615_v4 = vld [vmem:[%s4181_s16 + $0xb0] sm:$0xff]  }
 0xc94   : > { %2154 = vmatpush1.bf16.msra.mxu0 %v3573_v18  ;;  %v3617_v18 = vld [vmem:[%s4181_s16 + $0xf8] sm:$0xff]  }
 0xc95   : > { %2155 = vmatprep.subr.bf16.mxu0 %v3581_v8  ;;  %v3619_v8 = vld [vmem:[%s4181_s16 + $0xb8] sm:$0xff]  }
 0xc98   : > { %2156 = vmatpush1.bf16.msra.mxu0 %v3579_v10  ;;  %v1923_v10 = vrot.slane %v1918_v9, %v531_v46 }
 0xc99   : > { %2157 = vmatprep.subr.bf16.mxu0 %v3587_v12  ;;  %v1927_v12 = vrot.slane %v1918_v9, %v537_v51 }
 0xc9c   : > { %2158 = vmatpush1.bf16.msra.mxu0 %v3585_v16 }
 0xc9d   : > { %3264 = vmatprep.subr.bf16.mxu0 %v3589_v48 }
 0xd52   : > { %v1842_v31 = vpop.f32.mrb[28].mxu0 }
 0xd53   : > { %v1843_v33 = vadd.f32 %v1842_v31, %v1759_v30  ;;  %v3420_v34 = vpop.f32.mrb[29].mxu0 }
 0xd54   : > { %v1845_v35 = vpop.f32.mrb[30].mxu0  ;;  %v1881_v34 = vsub.s32 7, %v4252_v45 }
 0xd55   : > { %v4486_v37 = vadd.f32 %v3692_v36, %v1843_v33  ;;  %v1846_v38 = vadd.f32 %v1845_v35, %v1759_v30  ;;  %v3421_v39 = vpop.f32.mrb[31].mxu0  ;;  %v1876_v33 = vrot.slane %v4256_v47, %v1875_v6 }
 0xd56   : > { %v1882_v39 = vrot.slane %v4256_v47, %v1881_v34  ;;  %v3592_v47 = vld [vmem:[%s4181_s16 + $0x48] sm:$0xff]  }
 0xd57   : > { %v4488_v40 = vadd.f32 %v3693_v32, %v1846_v38  ;;  %1851 = vadd.xlane.f32.xlu1 %v4486_v37 }
 0xd59   : > { %1853 = vadd.xlane.f32.xlu0 %v4488_v40 }
 0xde4   : > { %v1852_v27 = vpop.xlane.xlu1 %1851 }
 0xde5   : > { %v1855_v53 = vmul.f32 0.0078125, %v1852_v27  ;;  %v3594_v27 = vld [vmem:[%s4181_s16 + $0x8] sm:$0xff]  }
 0xde6   : > { %v1854_v54 = vpop.xlane.xlu0 %1853 }
 0xde7   : > { %v4501_v63 = vsub.f32 %v4486_v37, %v1855_v53  ;;  %v1856_v14 = vmul.f32 0.0078125, %v1854_v54  ;;  %v3595_v53 = vld [vmem:[%s4181_s16 + $0x88] sm:$0xff]   ;;  %v3596_v54 = vld [vmem:[%s4181_s16 + $0x50] sm:$0xff]  }
 0xde9   : > { %v4504_v20 = vsub.f32 %v4488_v40, %v1856_v14  ;;  %v1859_v21 = vmul.f32 %v4501_v63, %v4501_v63  ;;  %v3598_v14 = vld [vmem:[%s4181_s16 + $0x10] sm:$0xff]  }
 0xdeb   : > { %1861 = vadd.xlane.f32.xlu0 %v1859_v21  ;;  %v1860_v13 = vmul.f32 %v4504_v20, %v4504_v20  ;;  %v3600_v21 = vld [vmem:[%s4181_s16 + $0x58] sm:$0xff]  }
 0xdef   : > { %1863 = vadd.xlane.f32.xlu0 %v1860_v13  ;;  %v3601_v13 = vld [vmem:[%s4181_s16 + $0xd8] sm:$0xff]  }
 0xe78   : > { %v1862_v19 = vpop.xlane.xlu0 %1861 }
 0xe79   : > { %v1865_v24 = vmul.f32 0.0078125, %v1862_v19 }
 0xe7b   : > { %v1867_v25 = vadd.f32 1e-05, %v1865_v24 }
 0xe7c   : > { %v1864_v26 = vpop.xlane.xlu0 %1863 }
 0xe7d   : > { %3656 = vrsqrt.f32 %v1867_v25  ;;  %v1866_v28 = vmul.f32 0.0078125, %v1864_v26 }
 0xe7f   : > { %v1868_v29 = vadd.f32 1e-05, %v1866_v28 }
 0xe81   : > { %3658 = vrsqrt.f32 %v1868_v29 }
 0xe87   : > { %v3657_v30 = vpop.eup %3656 }
 0xe88   : > { %v1871_v31 = vmul.f32 %v3657_v30, %v4501_v63  ;;  %v3597_v63 = vld [vmem:[%s4181_s16 + $0xd0] sm:$0xff]  }
 0xe8a   : > { %v1877_v38 = vmul.f32 %v1876_v33, %v1871_v31 }
 0xe8b   : > { %v3659_v35 = vpop.eup %3658 }
 0xe8c   : > { %v1872_v36 = vmul.f32 %v3659_v35, %v4504_v20  ;;  %v1883_v41 = vadd.f32 %v1882_v39, %v1877_v38  ;;  %v3599_v20 = vld [vmem:[%s4181_s16 + $0x90] sm:$0xff]  }
 0xe8e   : > { %v1878_v32 = vmul.f32 %v1876_v33, %v1872_v36 }
 0xe90   : > { %v1884_v42 = vadd.f32 %v1882_v39, %v1878_v32 }
 0xe92   : > { %v1885_v43 = vpack.c.bf16 %v1884_v42, %v1883_v41 }
 0xe94   : > { %2133 = vmatmul.mubr.bf16.vlgmr.msra.gmra.mrb[44].mxu1 %v1885_v43  ;;  %2176 = vmatmul.mubr.bf16.vlgmr.msra.gmra.mrb[32].mxu0 %v1885_v43 }
 0xe95   : > { %3243 = vmatpush3.bf16.msra.mxu1 %v3590_v49  ;;  %3265 = vmatpush3.bf16.msra.mxu0 %v3591_v50 }
 0xe96   : > { %3244 = vmatprep.subr.bf16.mxu1 %v3592_v47  ;;  %3266 = vmatprep.subr.bf16.mxu0 %v3593_v52 }
 0xe99   : > { %3245 = vmatpush3.bf16.msra.mxu1 %v3594_v27  ;;  %3267 = vmatpush3.bf16.msra.mxu0 %v3595_v53 }
 0xe9a   : > { %3246 = vmatprep.subr.bf16.mxu1 %v3596_v54  ;;  %3268 = vmatprep.subr.bf16.mxu0 %v3597_v63 }
 0xe9d   : > { %3247 = vmatpush3.bf16.msra.mxu1 %v3598_v14  ;;  %3269 = vmatpush3.bf16.msra.mxu0 %v3599_v20 }
 0xe9e   : > { %3248 = vmatprep.subr.bf16.mxu1 %v3600_v21  ;;  %3270 = vmatprep.subr.bf16.mxu0 %v3601_v13 }
 0xea1   : > { %3249 = vmatpush3.bf16.msra.mxu1 %v3602_v17  ;;  %3271 = vmatpush3.bf16.msra.mxu0 %v3603_v55 }
 0xea2   : > { %3250 = vmatprep.subr.bf16.mxu1 %v3604_v23  ;;  %3272 = vmatprep.subr.bf16.mxu0 %v3605_v56 }
 0xea5   : > { %3251 = vmatpush3.bf16.msra.mxu1 %v3606_v57  ;;  %3273 = vmatpush3.bf16.msra.mxu0 %v3607_v58 }
 0xea6   : > { %3252 = vmatprep.subr.bf16.mxu1 %v3608_v59  ;;  %3274 = vmatprep.subr.bf16.mxu0 %v3609_v61 }
 0xea9   : > { %3253 = vmatpush3.bf16.msra.mxu1 %v3610_v62  ;;  %3275 = vmatpush3.bf16.msra.mxu0 %v3611_v1 }
 0xeaa   : > { %3254 = vmatprep.subr.bf16.mxu1 %v3612_v22  ;;  %3276 = vmatprep.subr.bf16.mxu0 %v3613_v2 }
 0xead   : > { %3255 = vmatpush3.bf16.msra.mxu1 %v3614_v3  ;;  %3277 = vmatpush3.bf16.msra.mxu0 %v3615_v4 }
 0xeae   : > { %3256 = vmatprep.subr.bf16.mxu1 %v3616_v5  ;;  %3278 = vmatprep.subr.bf16.mxu0 %v3617_v18 }
 0xeb1   : > { %3257 = vmatpush3.bf16.msra.mxu1 %v3618_v7  ;;  %3279 = vmatpush3.bf16.msra.mxu0 %v3619_v8 }
 0xf67   : > { %v2134_v16 = vpop.f32.mrb[44].mxu1  ;;  %v2177_v19 = vpop.f32.mrb[32].mxu0 }
 0xf68   : > { %v4581_v24 = vadd.f32 %v2134_v16, %v1923_v10  ;;  %v4583_v25 = vadd.f32 %v2177_v19, %v1931_v11  ;;  %v2136_v26 = vpop.f32.mrb[45].mxu1  ;;  %v2179_v28 = vpop.f32.mrb[33].mxu0 }
 0xf69   : > { %v4585_v29 = vadd.f32 %v2136_v26, %v1927_v12  ;;  %v4587_v46 = vadd.f32 %v2179_v28, %v1935_v15  ;;  %v2138_v6 = vpop.f32.mrb[46].mxu1  ;;  %v2181_v0 = vpop.f32.mrb[34].mxu0 }
 0xf6a   : > { %v4590_v30 = vmul.f32 0.70710677, %v4581_v24  ;;  %v4593_v45 = vmul.f32 0.70710677, %v4583_v25  ;;  %v2140_v39 = vpop.f32.mrb[47].mxu1  ;;  %v2183_v32 = vpop.f32.mrb[35].mxu0  ;;  %v4605_v50 = vadd.f32 %v2138_v6, %v1923_v10  ;;  %v4607_v47 = vadd.f32 %v2181_v0, %v1931_v11 }
 0xf6b   : > { %v4596_v51 = vmul.f32 0.70710677, %v4585_v29  ;;  %v4599_v60 = vmul.f32 0.70710677, %v4587_v46  ;;  %v4612_v27 = vadd.f32 %v2140_v39, %v1927_v12  ;;  %v4617_v54 = vadd.f32 %v2183_v32, %v1935_v15 }
 0xf6c   : > { %v2202_v31 = vand.u32 2147483647, %v4590_v30  ;;  %v2204_v33 = vand.u32 2147483647, %v4593_v45  ;;  %v4610_v52 = vmul.f32 0.70710677, %v4605_v50 }
 0xf6d   : > { %v2203_v34 = vand.u32 2147483647, %v4596_v51  ;;  %v2205_v35 = vand.u32 2147483647, %v4599_v60  ;;  %v4615_v53 = vmul.f32 0.70710677, %v4607_v47 }
 0xf6e   : > { %v2210_v36 = vmul.f32 0.5, %v2202_v31  ;;  %v2212_v38 = vmul.f32 0.5, %v2204_v33  ;;  %v2206_v63 = vand.u32 2147483647, %v4610_v52  ;;  %v4621_v14 = vmul.f32 0.70710677, %v4612_v27 }
 0xf6f   : > { %v2211_v41 = vmul.f32 0.5, %v2203_v34  ;;  %v2213_v42 = vmul.f32 0.5, %v2205_v35  ;;  %v2208_v20 = vand.u32 2147483647, %v4615_v53  ;;  %v4625_v21 = vmul.f32 0.70710677, %v4617_v54 }
 0xf70   : > { %v2218_v43 = vadd.f32 1.0, %v2210_v36  ;;  %v2220_v44 = vadd.f32 1.0, %v2212_v38  ;;  %v2214_v13 = vmul.f32 0.5, %v2206_v63  ;;  %v4628_v17 = vand.u32 2147483647, %v4621_v14 }
 0xf71   : > { %v2219_v48 = vadd.f32 1.0, %v2211_v41  ;;  %v2221_v49 = vadd.f32 1.0, %v2213_v42  ;;  %v2216_v55 = vmul.f32 0.5, %v2208_v20  ;;  %v4631_v23 = vand.u32 2147483647, %v4625_v21 }
 0xf72   : > { %3660 = vrcp.f32 %v2218_v43  ;;  %v2222_v56 = vadd.f32 1.0, %v2214_v13  ;;  %v2215_v57 = vmul.f32 0.5, %v4628_v17  ;;  %v2242_v58 = vsub.f32 0.0, %v2202_v31 }
 0xf73   : > { %3662 = vrcp.f32 %v2220_v44  ;;  %v2224_v59 = vadd.f32 1.0, %v2216_v55  ;;  %v2217_v61 = vmul.f32 0.5, %v4631_v23  ;;  %v2244_v1 = vsub.f32 0.0, %v2204_v33 }
 0xf74   : > { %3664 = vrcp.f32 %v2219_v48  ;;  %v2243_v22 = vsub.f32 0.0, %v2203_v34  ;;  %v2223_v2 = vadd.f32 1.0, %v2215_v57  ;;  %v2245_v5 = vsub.f32 0.0, %v2205_v35 }
 0xf75   : > { %3666 = vrcp.f32 %v2221_v49  ;;  %v2225_v18 = vadd.f32 1.0, %v2217_v61  ;;  %v2250_v12 = vmul.f32 %v2242_v58, %v2202_v31  ;;  %v2252_v15 = vmul.f32 %v2244_v1, %v2204_v33 }
 0xf76   : > { %3668 = vrcp.f32 %v2222_v56  ;;  %v2251_v28 = vmul.f32 %v2243_v22, %v2203_v34  ;;  %v2253_v0 = vmul.f32 %v2245_v5, %v2205_v35  ;;  %v2246_v39 = vsub.f32 0.0, %v2206_v63 }
 0xf77   : > { %3670 = vrcp.f32 %v2224_v59  ;;  %v2248_v42 = vsub.f32 0.0, %v2208_v20  ;;  %v4650_v43 = vadd.f32 -1.2655122, %v2250_v12  ;;  %v4652_v31 = vadd.f32 -1.2655122, %v2252_v15 }
 0xf78   : > { %3672 = vrcp.f32 %v2223_v2  ;;  %v4656_v34 = vadd.f32 -1.2655122, %v2251_v28  ;;  %v4658_v49 = vadd.f32 -1.2655122, %v2253_v0  ;;  %v4663_v57 = vmul.f32 %v2246_v39, %v2206_v63 }
 0xf79   : > { %3674 = vrcp.f32 %v2225_v18  ;;  %v2247_v58 = vsub.f32 0.0, %v4628_v17  ;;  %v4670_v2 = vmul.f32 %v2248_v42, %v2208_v20  ;;  %v2249_v63 = vsub.f32 0.0, %v4631_v23 }
 0xf7a   : > { %vm2442_vm8 = vcmp.ge.f32.partialorder %v4590_v30, 0.0  ;;  %vm2444_vm9 = vcmp.ge.f32.partialorder %v4593_v45, 0.0  ;;  %vm2443_vm10 = vcmp.ge.f32.partialorder %v4596_v51, 0.0  ;;  %vm2445_vm11 = vcmp.ge.f32.partialorder %v4599_v60, 0.0 }
 0xf7b   : > { %vm2446_vm12 = vcmp.ge.f32.partialorder %v4610_v52, 0.0  ;;  %vm2448_vm13 = vcmp.ge.f32.partialorder %v4615_v53, 0.0  ;;  %vm2447_vm14 = vcmp.ge.f32.partialorder %v4621_v14, 0.0  ;;  %vm2449_vm15 = vcmp.ge.f32.partialorder %v4625_v21, 0.0 }
 0xf7c   : > { %v4635_v62 = vpop.eup %3660  ;;  %v2193_v53 = vmul.f32 0.5, %v4617_v54 }
 0xf7d   : > { %v4637_v3 = vpop.eup %3662  ;;  %v2266_v4 = vmul.f32 0.17087276, %v4635_v62 }
 0xf7e   : > { %v4640_v7 = vpop.eup %3664  ;;  %v2268_v8 = vmul.f32 0.17087276, %v4637_v3 }
 0xf7f   : > { %v4643_v9 = vpop.eup %3666  ;;  %v2274_v10 = vadd.f32 -0.82215226, %v2266_v4  ;;  %v2267_v11 = vmul.f32 0.17087276, %v4640_v7 }
 0xf80   : > { %v2276_v16 = vadd.f32 -0.82215226, %v2268_v8  ;;  %v2269_v19 = vmul.f32 0.17087276, %v4643_v9  ;;  %v4660_v13 = vpop.eup %3668 }
 0xf81   : > { %v2282_v26 = vmul.f32 %v4635_v62, %v2274_v10  ;;  %v2275_v6 = vadd.f32 -0.82215226, %v2267_v11  ;;  %v4666_v59 = vpop.eup %3670  ;;  %v2270_v22 = vmul.f32 0.17087276, %v4660_v13 }
 0xf82   : > { %v2284_v36 = vmul.f32 %v4637_v3, %v2276_v16  ;;  %v2277_v38 = vadd.f32 -0.82215226, %v2269_v19  ;;  %v4672_v4 = vpop.eup %3672  ;;  %v2272_v8 = vmul.f32 0.17087276, %v4666_v59 }
 0xf83   : > { %v2290_v32 = vadd.f32 1.4885159, %v2282_v26  ;;  %v2283_v41 = vmul.f32 %v4640_v7, %v2275_v6  ;;  %v4677_v10 = vpop.eup %3674  ;;  %v2278_v15 = vadd.f32 -0.82215226, %v2270_v22  ;;  %v2271_v16 = vmul.f32 0.17087276, %v4672_v4 }
 0xf84   : > { %v2292_v33 = vadd.f32 1.4885159, %v2284_v36  ;;  %v2285_v44 = vmul.f32 %v4643_v9, %v2277_v38  ;;  %v2280_v26 = vadd.f32 -0.82215226, %v2272_v8  ;;  %v2273_v28 = vmul.f32 0.17087276, %v4677_v10 }
 0xf85   : > { %v2298_v48 = vmul.f32 %v4635_v62, %v2290_v32  ;;  %v2291_v35 = vadd.f32 1.4885159, %v2283_v41  ;;  %v2286_v36 = vmul.f32 %v4660_v13, %v2278_v15  ;;  %v2279_v38 = vadd.f32 -0.82215226, %v2271_v16 }
 0xf86   : > { %v2300_v55 = vmul.f32 %v4637_v3, %v2292_v33  ;;  %v2293_v56 = vadd.f32 1.4885159, %v2285_v44  ;;  %v2288_v41 = vmul.f32 %v4666_v59, %v2280_v26  ;;  %v2281_v42 = vadd.f32 -0.82215226, %v2273_v28 }
 0xf87   : > { %v2306_v61 = vadd.f32 -1.135204, %v2298_v48  ;;  %v2299_v1 = vmul.f32 %v4640_v7, %v2291_v35  ;;  %v2294_v48 = vadd.f32 1.4885159, %v2286_v36  ;;  %v2287_v35 = vmul.f32 %v4672_v4, %v2279_v38 }
 0xf88   : > { %v2308_v5 = vadd.f32 -1.135204, %v2300_v55  ;;  %v2301_v18 = vmul.f32 %v4643_v9, %v2293_v56 }
 0xf89   : > { %v2314_v11 = vmul.f32 %v4635_v62, %v2306_v61  ;;  %v2307_v12 = vadd.f32 -1.135204, %v2299_v1  ;;  %v2296_v61 = vadd.f32 1.4885159, %v2288_v41  ;;  %v2289_v1 = vmul.f32 %v4677_v10, %v2281_v42 }
 0xf8a   : > { %v2316_v20 = vmul.f32 %v4637_v3, %v2308_v5  ;;  %v2309_v19 = vadd.f32 -1.135204, %v2301_v18  ;;  %v2302_v18 = vmul.f32 %v4660_v13, %v2294_v48  ;;  %v2295_v8 = vadd.f32 1.4885159, %v2287_v35 }
 0xf8b   : > { %v2322_v6 = vadd.f32 0.27886808, %v2314_v11  ;;  %v2315_v0 = vmul.f32 %v4640_v7, %v2307_v12  ;;  %v2304_v15 = vmul.f32 %v4666_v59, %v2296_v61  ;;  %v2297_v16 = vadd.f32 1.4885159, %v2289_v1 }
 0xf8c   : > { %v2324_v39 = vadd.f32 0.27886808, %v2316_v20  ;;  %v2317_v32 = vmul.f32 %v4643_v9, %v2309_v19  ;;  %v2310_v26 = vadd.f32 -1.135204, %v2302_v18  ;;  %v2303_v28 = vmul.f32 %v4672_v4, %v2295_v8 }
 0xf8d   : > { %v2330_v33 = vmul.f32 %v4635_v62, %v2322_v6  ;;  %v2323_v44 = vadd.f32 0.27886808, %v2315_v0  ;;  %v2312_v36 = vadd.f32 -1.135204, %v2304_v15  ;;  %v2305_v38 = vmul.f32 %v4677_v10, %v2297_v16 }
 0xf8e   : > { %v2332_v55 = vmul.f32 %v4637_v3, %v2324_v39  ;;  %v2325_v56 = vadd.f32 0.27886808, %v2317_v32  ;;  %v2318_v41 = vmul.f32 %v4660_v13, %v2310_v26  ;;  %v2311_v42 = vadd.f32 -1.135204, %v2303_v28 }
 0xf8f   : > { %v2338_v22 = vadd.f32 -0.18628806, %v2330_v33  ;;  %v2331_v5 = vmul.f32 %v4640_v7, %v2323_v44  ;;  %v2320_v48 = vmul.f32 %v4666_v59, %v2312_v36  ;;  %v2313_v35 = vadd.f32 -1.135204, %v2305_v38 }
 0xf90   : > { %v2340_v11 = vadd.f32 -0.18628806, %v2332_v55  ;;  %v2333_v12 = vmul.f32 %v4643_v9, %v2325_v56  ;;  %v2326_v61 = vadd.f32 0.27886808, %v2318_v41  ;;  %v2319_v1 = vmul.f32 %v4672_v4, %v2311_v42 }
 0xf91   : > { %v2346_v20 = vmul.f32 %v4635_v62, %v2338_v22  ;;  %v2339_v19 = vadd.f32 -0.18628806, %v2331_v5  ;;  %v2328_v18 = vadd.f32 0.27886808, %v2320_v48  ;;  %v2321_v8 = vmul.f32 %v4677_v10, %v2313_v35 }
 0xf92   : > { %v2348_v6 = vmul.f32 %v4637_v3, %v2340_v11  ;;  %v2341_v0 = vadd.f32 -0.18628806, %v2333_v12  ;;  %v2334_v15 = vmul.f32 %v4660_v13, %v2326_v61  ;;  %v2327_v16 = vadd.f32 0.27886808, %v2319_v1 }
 0xf93   : > { %v2354_v39 = vadd.f32 0.09678418, %v2346_v20  ;;  %v2347_v32 = vmul.f32 %v4640_v7, %v2339_v19  ;;  %v2336_v26 = vmul.f32 %v4666_v59, %v2328_v18  ;;  %v2329_v28 = vadd.f32 0.27886808, %v2321_v8 }
 0xf94   : > { %v2356_v33 = vadd.f32 0.09678418, %v2348_v6  ;;  %v2349_v44 = vmul.f32 %v4643_v9, %v2341_v0  ;;  %v2342_v36 = vadd.f32 -0.18628806, %v2334_v15  ;;  %v2335_v38 = vmul.f32 %v4672_v4, %v2327_v16 }
 0xf95   : > { %v2362_v55 = vmul.f32 %v4635_v62, %v2354_v39  ;;  %v2355_v56 = vadd.f32 0.09678418, %v2347_v32  ;;  %v2344_v41 = vadd.f32 -0.18628806, %v2336_v26  ;;  %v2337_v42 = vmul.f32 %v4677_v10, %v2329_v28 }
 0xf96   : > { %v2364_v22 = vmul.f32 %v4637_v3, %v2356_v33  ;;  %v2357_v5 = vadd.f32 0.09678418, %v2349_v44  ;;  %v2350_v48 = vmul.f32 %v4660_v13, %v2342_v36  ;;  %v2343_v35 = vadd.f32 -0.18628806, %v2335_v38 }
 0xf97   : > { %v2370_v11 = vadd.f32 0.37409195, %v2362_v55  ;;  %v2363_v12 = vmul.f32 %v4640_v7, %v2355_v56  ;;  %v2352_v61 = vmul.f32 %v4666_v59, %v2344_v41  ;;  %v2345_v1 = vadd.f32 -0.18628806, %v2337_v42 }
 0xf98   : > { %v2372_v20 = vadd.f32 0.37409195, %v2364_v22  ;;  %v2365_v19 = vmul.f32 %v4643_v9, %v2357_v5  ;;  %v2358_v18 = vadd.f32 0.09678418, %v2350_v48  ;;  %v2351_v8 = vmul.f32 %v4672_v4, %v2343_v35 }
 0xf99   : > { %v2378_v6 = vmul.f32 %v4635_v62, %v2370_v11  ;;  %v2371_v0 = vadd.f32 0.37409195, %v2363_v12  ;;  %v2360_v15 = vadd.f32 0.09678418, %v2352_v61  ;;  %v2353_v16 = vmul.f32 %v4677_v10, %v2345_v1 }
 0xf9a   : > { %v2380_v39 = vmul.f32 %v4637_v3, %v2372_v20  ;;  %v2373_v32 = vadd.f32 0.37409195, %v2365_v19  ;;  %v2366_v26 = vmul.f32 %v4660_v13, %v2358_v18  ;;  %v2359_v28 = vadd.f32 0.09678418, %v2351_v8 }
 0xf9b   : > { %v2386_v33 = vadd.f32 1.0000237, %v2378_v6  ;;  %v2379_v44 = vmul.f32 %v4640_v7, %v2371_v0  ;;  %v2368_v36 = vmul.f32 %v4666_v59, %v2360_v15  ;;  %v2361_v38 = vadd.f32 0.09678418, %v2353_v16 }
 0xf9c   : > { %v2388_v55 = vadd.f32 1.0000237, %v2380_v39  ;;  %v2381_v56 = vmul.f32 %v4643_v9, %v2373_v32  ;;  %v2374_v41 = vadd.f32 0.37409195, %v2366_v26  ;;  %v2367_v42 = vmul.f32 %v4672_v4, %v2359_v28 }
 0xf9d   : > { %v2394_v22 = vmul.f32 %v4635_v62, %v2386_v33  ;;  %v2387_v5 = vadd.f32 1.0000237, %v2379_v44  ;;  %v2376_v44 = vadd.f32 0.37409195, %v2368_v36  ;;  %v2369_v48 = vmul.f32 %v4677_v10, %v2361_v38 }
 0xf9e   : > { %v2396_v11 = vmul.f32 %v4637_v3, %v2388_v55  ;;  %v2389_v12 = vadd.f32 1.0000237, %v2381_v56  ;;  %v2375_v55 = vadd.f32 0.37409195, %v2367_v42  ;;  %v2257_v18 = vmul.f32 %v2249_v63, %v4631_v23 }
 0xf9f   : > { %v2402_v20 = vadd.f32 %v4650_v43, %v2394_v22  ;;  %v2395_v19 = vmul.f32 %v4640_v7, %v2387_v5  ;;  %v2384_v61 = vmul.f32 %v4666_v59, %v2376_v44  ;;  %v2377_v1 = vadd.f32 0.37409195, %v2369_v48 }
 0xfa0   : > { %v2404_v6 = vadd.f32 %v4652_v31, %v2396_v11  ;;  %v2397_v0 = vmul.f32 %v4643_v9, %v2389_v12  ;;  %v2382_v31 = vmul.f32 %v4660_v13, %v2374_v41  ;;  %v2255_v22 = vmul.f32 %v2247_v58, %v4628_v17 }
 0xfa1   : > { %v2410_v39 = vmul.f32 1.442695, %v2402_v20  ;;  %v2403_v32 = vadd.f32 %v4656_v34, %v2395_v19  ;;  %v2392_v5 = vadd.f32 1.0000237, %v2384_v61  ;;  %v2385_v8 = vmul.f32 %v4677_v10, %v2377_v1 }
 0xfa2   : > { %v2414_v33 = vmul.f32 1.442695, %v2404_v6  ;;  %v2405_v43 = vadd.f32 %v4658_v49, %v2397_v0  ;;  %v2390_v34 = vadd.f32 1.0000237, %v2382_v31  ;;  %v2383_v49 = vmul.f32 %v4672_v4, %v2375_v55 }
 0xfa3   : > { %3676 = vpow2.f32 %v2410_v39  ;;  %v2412_v35 = vmul.f32 1.442695, %v2403_v32  ;;  %v3138_v11 = vadd.f32 -1.2655122, %v4663_v57  ;;  %v3140_v16 = vadd.f32 -1.2655122, %v4670_v2 }
 0xfa4   : > { %3678 = vpow2.f32 %v2414_v33  ;;  %v2416_v56 = vmul.f32 1.442695, %v2405_v43  ;;  %v2398_v12 = vmul.f32 %v4660_v13, %v2390_v34  ;;  %v2391_v15 = vadd.f32 1.0000237, %v2383_v49 }
 0xfa5   : > { %3680 = vpow2.f32 %v2412_v35  ;;  %v2400_v20 = vmul.f32 %v4666_v59, %v2392_v5  ;;  %v2393_v17 = vadd.f32 1.0000237, %v2385_v8  ;;  %v3139_v19 = vadd.f32 -1.2655122, %v2255_v22 }
 0xfa6   : > { %3682 = vpow2.f32 %v2416_v56  ;;  %v2406_v58 = vadd.f32 %v3138_v11, %v2398_v12  ;;  %v2399_v26 = vmul.f32 %v4672_v4, %v2391_v15  ;;  %v3141_v6 = vadd.f32 -1.2655122, %v2257_v18 }
 0xfa7   : > { %v2408_v28 = vadd.f32 %v3140_v16, %v2400_v20  ;;  %v2401_v23 = vmul.f32 %v4677_v10, %v2393_v17  ;;  %v2186_v1 = vmul.f32 0.5, %v4581_v24  ;;  %v2188_v5 = vmul.f32 0.5, %v4583_v25 }
 0xfa8   : > { %v2418_v63 = vmul.f32 1.442695, %v2406_v58  ;;  %v2407_v0 = vadd.f32 %v3139_v19, %v2399_v26  ;;  %v2187_v11 = vmul.f32 0.5, %v4585_v29  ;;  %v2189_v16 = vmul.f32 0.5, %v4587_v46 }
 0xfa9   : > { %v2422_v36 = vmul.f32 1.442695, %v2408_v28  ;;  %v2409_v57 = vadd.f32 %v3141_v6, %v2401_v23 }
 0xfaa   : > { %3684 = vpow2.f32 %v2418_v63  ;;  %v2420_v39 = vmul.f32 1.442695, %v2407_v0 }
 0xfab   : > { %3686 = vpow2.f32 %v2422_v36  ;;  %v2424_v41 = vmul.f32 1.442695, %v2409_v57 }
 0xfac   : > { %3688 = vpow2.f32 %v2420_v39  ;;  %v2192_v39 = vmul.f32 0.5, %v4607_v47 }
 0xfad   : > { %v3677_v38 = vpop.eup %3676  ;;  %3690 = vpow2.f32 %v2424_v41 }
 0xfae   : > { %v3679_v32 = vpop.eup %3678  ;;  %v2426_v2 = vmul.f32 %v3677_v38, %v4635_v62 }
 0xfaf   : > { %v3681_v42 = vpop.eup %3680  ;;  %v2428_v33 = vmul.f32 %v3679_v32, %v4637_v3 }
 0xfb0   : > { %v3683_v43 = vpop.eup %3682  ;;  %v2434_v44 = vsub.f32 1.0, %v2426_v2  ;;  %v2427_v48 = vmul.f32 %v3681_v42, %v4640_v7  ;;  %v2191_v2 = vmul.f32 0.5, %v4612_v27  ;;  %v3142_v27 = vld [vmem:[%s4192_s28 + $0x8] ss:$0 sm:$0xff] }
 0xfb1   : > { %v2436_v35 = vsub.f32 1.0, %v2428_v33  ;;  %v2429_v31 = vmul.f32 %v3683_v43, %v4643_v9 }
 0xfb2   : > { %v2450_v55 = vsub.f32 0.0, %v2434_v44  ;;  %v2435_v56 = vsub.f32 1.0, %v2427_v48 }
 0xfb3   : > { %v2452_v61 = vsub.f32 0.0, %v2436_v35  ;;  %v2437_v62 = vsub.f32 1.0, %v2429_v31 }
 0xfb4   : > { %v2458_v34 = vsel %vm2442_vm8, %v2434_v44, %v2450_v55  ;;  %v2451_v3 = vsub.f32 0.0, %v2435_v56  ;;  %v3685_v30 = vpop.eup %3684 }
 0xfb5   : > { %v2466_v22 = vadd.f32 1.0, %v2458_v34  ;;  %v2460_v49 = vsel %vm2444_vm9, %v2436_v35, %v2452_v61  ;;  %v2453_v7 = vsub.f32 0.0, %v2437_v62  ;;  %v3687_v15 = vpop.eup %3686  ;;  %v2430_v51 = vmul.f32 %v3685_v30, %v4660_v13 }
 0xfb6   : > { %v2468_v9 = vadd.f32 1.0, %v2460_v49  ;;  %v2459_v18 = vsel %vm2443_vm10, %v2435_v56, %v2451_v3  ;;  %v3689_v17 = vpop.eup %3688  ;;  %v2432_v25 = vmul.f32 %v3687_v15, %v4666_v59  ;;  %v2190_v13 = vmul.f32 0.5, %v4605_v50 }
 0xfb7   : > { %v2474_v8 = vmul.f32 %v2466_v22, %v2186_v1  ;;  %v2467_v24 = vadd.f32 1.0, %v2459_v18  ;;  %v2461_v12 = vsel %vm2445_vm11, %v2437_v62, %v2453_v7  ;;  %v3691_v19 = vpop.eup %3690  ;;  %v2438_v60 = vsub.f32 1.0, %v2430_v51 }
 0xfb8   : > { %v2476_v45 = vmul.f32 %v2468_v9, %v2188_v5  ;;  %v2469_v20 = vadd.f32 1.0, %v2461_v12  ;;  %v2431_v28 = vmul.f32 %v3689_v17, %v4672_v4  ;;  %v2440_v6 = vsub.f32 1.0, %v2432_v25 }
 0xfb9   : > { %v2475_v58 = vmul.f32 %v2467_v24, %v2187_v11  ;;  %v2433_v29 = vmul.f32 %v3691_v19, %v4677_v10  ;;  %v2454_v23 = vsub.f32 0.0, %v2438_v60 }
 0xfba   : > { %v2477_v26 = vmul.f32 %v2469_v20, %v2189_v16  ;;  %v2439_v63 = vsub.f32 1.0, %v2431_v28  ;;  %v2456_v46 = vsub.f32 0.0, %v2440_v6 }
 0xfbb   : > { %v2441_v0 = vsub.f32 1.0, %v2433_v29  ;;  %v2462_v36 = vsel %vm2446_vm12, %v2438_v60, %v2454_v23  ;;  %v3176_v60 = vld [vmem:[%s4826_s7] ss:$0 sm:$0xff] (!%p3175_p5) }
 0xfbc   : > { %v2455_v59 = vsub.f32 0.0, %v2439_v63  ;;  %v2470_v57 = vadd.f32 1.0, %v2462_v36  ;;  %v2464_v38 = vsel %vm2448_vm13, %v2440_v6, %v2456_v46  ;;  %v3177_v6 = vld [vmem:[%s4827_s8] ss:$0 sm:$0xff] (!%p3175_p5) }
 0xfbd   : > { %v2457_v4 = vsub.f32 0.0, %v2441_v0  ;;  %v2472_v10 = vadd.f32 1.0, %v2464_v38 }
 0xfbe   : > { %v2463_v32 = vsel %vm2447_vm14, %v2439_v63, %v2455_v59  ;;  %v2478_v52 = vmul.f32 %v2470_v57, %v2190_v13 }
 0xfbf   : > { %v2471_v41 = vadd.f32 1.0, %v2463_v32  ;;  %v2465_v50 = vsel %vm2449_vm15, %v2441_v0, %v2457_v4  ;;  %v2480_v42 = vmul.f32 %v2472_v10, %v2192_v39 }
 0xfc0   : > { %v2473_v33 = vadd.f32 1.0, %v2465_v50  ;;  %v2482_v43 = vpack.c.bf16 %v2478_v52, %v2474_v8 }
 0xfc1   : > { %v2479_v44 = vmul.f32 %v2471_v41, %v2191_v2  ;;  %v2484_v14 = vpack.c.bf16 %v2480_v42, %v2476_v45 }
 0xfc2   : > { %v2481_v48 = vmul.f32 %v2473_v33, %v2193_v53 }
 0xfc3   : > { %v2483_v35 = vpack.c.bf16 %v2479_v44, %v2475_v58 }
 0xfc4   : > { %v2485_v47 = vpack.c.bf16 %v2481_v48, %v2477_v26 }
 0xfc5   : > { %2778 = vmatprep.mubr.bf16.mxu1 %v2483_v35 }
 0xfc6   : > { %2819 = vmatprep.mubr.bf16.mxu0 %v2485_v47  ;;  %2779 = vmatmul.mubr.bf16.vlgmr.msra.gmra.mrb[48].mxu1 %v2482_v43 }
 0xfc7   : > { %2820 = vmatmul.mubr.bf16.vlgmr.msra.gmra.mrb[36].mxu0 %v2484_v14 }
0x1099   : > { %v3258_v21 = vpop.f32.mrb[48].mxu1 }
0x109a   : > { %v3280_v31 = vpop.f32.mrb[36].mxu0  ;;  %v3259_v55 = vpop.f32.mrb[49].mxu1 }
0x109b   : > { %v3260_v56 = vadd.f32 %v3259_v55, %v3258_v21  ;;  %v3281_v61 = vpop.f32.mrb[37].mxu0  ;;  %v3261_v62 = vpop.f32.mrb[50].mxu1 }
0x109c   : > { %v3282_v1 = vadd.f32 %v3281_v61, %v3280_v31  ;;  %v3283_v54 = vpop.f32.mrb[38].mxu0  ;;  %v3262_v34 = vpop.f32.mrb[51].mxu1 }
0x109d   : > { %v2781_v3 = vadd.f32 %v3260_v56, %v3142_v27  ;;  %v3263_v22 = vadd.f32 %v3262_v34, %v3261_v62  ;;  %v3284_v49 = vpop.f32.mrb[39].mxu0 }
0x109e   : > { %v3285_v7 = vadd.f32 %v3284_v49, %v3283_v54 }
0x109f   : > { %v2822_v5 = vadd.f32 %v3282_v1, %v2781_v3  ;;  %v2784_v9 = vadd.f32 %v3263_v22, %v3142_v27  ;;  %2835 = sbr.rel (%p3175_p5) target bundleno = 4575 (0x11df), region = 80 }
0x10a1   : > { %v2828_v18 = vadd.f32 %v2822_v5, %v4486_v37  ;;  %v2825_v30 = vadd.f32 %v3285_v7, %v2784_v9 }
0x10a3   : > { %2830 = vst [vmem:[#allocation11] sm:$0xff] %v2828_v18  ;;  %v2829_v8 = vadd.f32 %v2825_v30, %v4488_v40  ;;  %2838 = vadd.xlane.f32.xlu0 (!%p3175_p5), %v2828_v18 }
0x10a5   : > { %2831 = vst [vmem:[#allocation11 + $0x8] sm:$0xff] %v2829_v8 }
0x10a7   : > { %2840 = vadd.xlane.f32.xlu0 %v2829_v8 }
0x1130   : > { %v2839_v11 = vpop.xlane.xlu0 %2838 }
0x1131   : > { %v2842_v24 = vmul.f32 0.0078125, %v2839_v11 }
0x1133   : > { %v2844_v12 = vsub.f32 %v2828_v18, %v2842_v24 }
0x1134   : > { %v2841_v15 = vpop.xlane.xlu0 %2840 }
0x1135   : > { %v2843_v45 = vmul.f32 0.0078125, %v2841_v15  ;;  %v2846_v16 = vmul.f32 %v2844_v12, %v2844_v12 }
0x1137   : > { %v2845_v20 = vsub.f32 %v2829_v8, %v2843_v45  ;;  %2848 = vadd.xlane.f32.xlu1 %v2846_v16 }
0x1139   : > { %v2847_v51 = vmul.f32 %v2845_v20, %v2845_v20 }
0x113b   : > { %2850 = vadd.xlane.f32.xlu1 %v2847_v51 }
0x11c4   : > { %v2849_v37 = vpop.xlane.xlu1 %2848 }
0x11c5   : > { %v2852_v17 = vmul.f32 0.0078125, %v2849_v37 }
0x11c7   : > { %v2854_v58 = vadd.f32 1e-05, %v2852_v17 }
0x11c8   : > { %v2851_v40 = vpop.xlane.xlu1 %2850 }
0x11c9   : > { %3694 = vrsqrt.f32 %v2854_v58  ;;  %v2853_v25 = vmul.f32 0.0078125, %v2851_v40 }
0x11cb   : > { %v2855_v19 = vadd.f32 1e-05, %v2853_v25 }
0x11cd   : > { %3696 = vrsqrt.f32 %v2855_v19 }
0x11d3   : > { %v3695_v26 = vpop.eup %3694 }
0x11d4   : > { %v2858_v28 = vmul.f32 %v3695_v26, %v2844_v12 }
0x11d6   : > { %v2866_v29 = vmul.f32 %v3176_v60, %v2858_v28 }
0x11d7   : > { %v3697_v23 = vpop.eup %3696 }
0x11d8   : > { %v2874_v63 = vadd.f32 %v3177_v6, %v2866_v29  ;;  %v2859_v46 = vmul.f32 %v3697_v23, %v2845_v20 }
0x11da   : > { %2876 = vst [vmem:[#allocation11] sm:$0xff] %v2874_v63  ;;  %v2867_v0 = vmul.f32 %v3176_v60, %v2859_v46 }
0x11dc   : > { %v2875_v13 = vadd.f32 %v3177_v6, %v2867_v0 }
0x11de   : > { %2877 = vst [vmem:[#allocation11 + $0x8] sm:$0xff] %v2875_v13 }
0x11df PF: > { %p3451_p6 = scmp.eq.s32.totalorder %s3980_s13, 1  ;;  %s3908_s23 = smov [#allocation11]  }
0x11e0   : > { %s2884_s21 = sshll.u32 %s3908_s23, 4  ;;  %s2885_s21 = int_to_ptr.vmem [resolvable:$true] %s2884_s21 }
0x11e1   : > { %s3818_s11 = scalar_lea.vmem %s2885_s21, 256  ;;  %p3825_p13 = scmp.lt.s32.totalorder %s2885_s21, %s2885_s21 }
0x11e2   : > { %p3819_p1 = scmp.ne.s32.totalorder %s2885_s21, %s3818_s11  ;;  %p3826_p9 = scmp.lt.s32.totalorder %s3818_s11, %s3818_s11 }
0x11e4   : > { %p3820_p4 = pnand %p3819_p1, %p3451_p6  ;;  %p3827_p0 = por %p3826_p9, %p3825_p13 }
0x11e6   : > { %p3821_p11 = pneg %p3820_p4 }
0x11e8   : > { %p3828_p12 = pnand %p3827_p0, %p3821_p11 }
0x11ea   : > { %3831 = shalt.err (!%p3828_p12)
}
0x11eb   : > { %s3832_s28 = scalar_lea.hbm %s4828_s9, 256 }
0x11ec   : > { %p3833_p2 = scmp.ne.s32.totalorder %s4828_s9, %s3832_s28  ;;  %p3838_p8 = scmp.lt.u32.totalorder %s3832_s28, %s4828_s9 }
0x11ee   : > { %p3834_p10 = pnand %p3833_p2, %p3451_p6 }
0x11f0   : > { %p3835_p7 = pneg %p3834_p10 }
0x11f2   : > { %p3840_p3 = pnand %p3838_p8, %p3835_p7 }
0x11f4   : > { %3843 = shalt.err (!%p3840_p3)
}
0x11f5   : > { %s3909_s1 = smov 128   ;;  %s3910_s19 = smov 8  }
0x11f6   : > { %3434 = dma.vmem_to_hbm [thread:$0]  (%p3451_p6), %s2885_s21, 256, %s4828_s9, [#allocation5], %s3909_s1, %s3909_s1, %s3910_s19  }
0x11f7   : > { %3873 = dma.done.wait (%p3451_p6), [#allocation5], 256  }
0x11f8   : > { %3875 = vsyncadd (%p3451_p6), [#allocation5], 4294967040 }
0x11f9 PF: > { %s4849_s27 = sld [smem:[#allocation16_spill]]  ;;  %s4850_s11 = sld [smem:[#allocation17_spill]] }
0x11fa   : > { %p26_p5 = scmp.ge.s32.totalorder %s3983_s14, 4   ;;  %s4851_s30 = smov %s3882_s10 }
0x11fb   : > { %s4853_s12 = smov %s3983_s14 }
0x11fc   :  { %28 = sbr.rel (!%p26_p5) target bundleno = 11 (0xb), region = 144 }
0x11ff   : > { %s4852_s10 = smov %s4849_s27 }
0x1203   :  { %2900 = vsyncpa [#allocation4], 1 }
0x1204   :  { %2902 = vsyncpa [#allocation4 + $0x1], 1 }
0x1205   :  { %2903 = vsyncpa [#allocation7], 1 }
0x1206   :  { %2905 = vsyncpa [#allocation7 + $0x1], 1 }
0x1207   :  { %2906 = vsyncpa [#allocation10], 1 }
0x1208   :  { %2908 = vsyncpa [#allocation10 + $0x1], 1 }
0x1209   :  { %2909 = vsyncpa [#allocation5], 1 }
0x120a   :  { %2911 = vsyncpa [#allocation5 + $0x1], 1 }

</bundles_post_ra>
